<compile_context>
chip_gen: v6e
topology: v6e:2x2x1
jax: 0.10.0
libtpu: 0.0.40
codegen_flags: <defaults>
</compile_context>

<pallas_src>
import math

import jax
import jax.numpy as jnp
import numpy as np
from jax.experimental import pallas as pl
from jax.experimental.pallas import tpu as pltpu

OBS_DIM = 16
ACTION_DIM = 4
H1 = 1024
H2 = 512
H3 = 300          # logical (PyTorch) width of layer 3
H3_PAD = 384      # padded to a multiple of 128 lanes
BATCH = 8


def _critic_kernel(x_ref, a_ref,
                   w1_ref, b1_ref,
                   w2x_ref, w2a_ref, b2_ref,
                   w3_ref, b3_ref,
                   w4_ref, b4_ref,
                   q_ref):
    # Layer 1: relu(x @ W1 + b1).  bf16 MXU inputs, fp32 accumulation.
    x = x_ref[...].astype(jnp.bfloat16)
    h1 = jnp.dot(x, w1_ref[...], preferred_element_type=jnp.float32) + b1_ref[...]
    h1 = jnp.maximum(h1, 0.0)

    # Layer 2 on cat([h1, a], 1) as a split matmul.
    h2 = jnp.dot(h1.astype(jnp.bfloat16), w2x_ref[...],
                 preferred_element_type=jnp.float32) + b2_ref[...]
    # The `a` contribution is only K=4 -> 4 broadcast FMAs on the VPU
    # instead of a (mostly pipeline-bubble) MXU pass.
    for k in range(ACTION_DIM):
        a_col = a_ref[:, k:k + 1]                              # (B, 1)  f32
        w_row = w2a_ref[k:k + 1, :].astype(jnp.float32)        # (1, H2)
        h2 = h2 + a_col * w_row
    h2 = jnp.maximum(h2, 0.0)

    # Layer 3 (zero-padded 300 -> 384; pad lanes are exactly 0 after relu).
    h3 = jnp.dot(h2.astype(jnp.bfloat16), w3_ref[...],
                 preferred_element_type=jnp.float32) + b3_ref[...]
    h3 = jnp.maximum(h3, 0.0)

    # Layer 4 (no activation): VPU multiply + XLU lane reduction (avoids an
    # MXU pass that would produce a single masked output column).
    w4 = w4_ref[...].astype(jnp.float32)                       # (1, H3_PAD)
    q_ref[...] = jnp.sum(h3 * w4, axis=-1, keepdims=True) + b4_ref[...]


def critic_forward(x, a, params, *, batch_tile=None):
    """x: (B, obs_dim) f32, a: (B, action_dim) f32 -> (B, 1) f32."""
    B = x.shape[0]
    inputs = (x, a,
              params["w1"], params["b1"],
              params["w2x"], params["w2a"], params["b2"],
              params["w3"], params["b3"],
              params["w4"], params["b4"])

    flops = 2 * B * (OBS_DIM * H1 + H1 * H2 + ACTION_DIM * H2
                     + H2 * H3_PAD + H3_PAD)
    weight_bytes = sum(int(np.prod(p.shape)) * p.dtype.itemsize
                       for p in params.values())
    act_bytes = (x.size * x.dtype.itemsize + a.size * a.dtype.itemsize + B * 4)
    cost = pl.CostEstimate(flops=flops, transcendentals=0,
                           bytes_accessed=weight_bytes + act_bytes)

    out_shape = jax.ShapeDtypeStruct((B, 1), jnp.float32)

    if batch_tile is None or batch_tile >= B or B % batch_tile != 0:
        # Small-batch / inference path: single block, everything VMEM-resident
        # (~1.5 MB of bf16 weights; far below every chip's scoped VMEM limit).
        vmem = pl.BlockSpec(memory_space=pltpu.MemorySpace.VMEM)
        return pl.pallas_call(
            _critic_kernel,
            out_shape=out_shape,
            in_specs=[vmem] * len(inputs),
            out_specs=vmem,
            cost_estimate=cost,
        )(*inputs)

    # Training-sized-batch path: tile the batch dimension, mark it "parallel"
    # (shards across TensorCores on multi-TC chips).  Weights use the same
    # block on every grid step so they stay resident in VMEM (fetched once).
    tile = batch_tile

    def full_block(p):
        return pl.BlockSpec(p.shape, lambda i: (0, 0))

    in_specs = [
        pl.BlockSpec((tile, OBS_DIM), lambda i: (i, 0)),
        pl.BlockSpec((tile, ACTION_DIM), lambda i: (i, 0)),
        full_block(params["w1"]), full_block(params["b1"]),
        full_block(params["w2x"]), full_block(params["w2a"]),
        full_block(params["b2"]),
        full_block(params["w3"]), full_block(params["b3"]),
        full_block(params["w4"]), full_block(params["b4"]),
    ]
    out_specs = pl.BlockSpec((tile, 1), lambda i: (i, 0))

    return pl.pallas_call(
        _critic_kernel,
        out_shape=out_shape,
        grid=(B // tile,),
        in_specs=in_specs,
        out_specs=out_specs,
        compiler_params=pltpu.CompilerParams(
            dimension_semantics=("parallel",)),
        cost_estimate=cost,
    )(*inputs)


def init_params(key):
    """PyTorch nn.Linear-style init (U[-1/sqrt(fan_in), +1/sqrt(fan_in)]).

    Weights are stored transposed (in_features, out_features); W2 is pre-split
    into its h1 part and its action part; layer 3/4 are zero-padded 300 -> 384;
    W4 is stored as a (1, 384) row vector.  Weights are bf16, biases fp32.
    """
    def linear(key, fan_in, fan_out):
        kw, kb = jax.random.split(key)
        bound = 1.0 / math.sqrt(fan_in)
        w = jax.random.uniform(kw, (fan_in, fan_out), jnp.float32, -bound, bound)
        b = jax.random.uniform(kb, (1, fan_out), jnp.float32, -bound, bound)
        return w, b

    k1, k2, k3, k4 = jax.random.split(key, 4)
    w1, b1 = linear(k1, OBS_DIM, H1)
    w2, b2 = linear(k2, H1 + ACTION_DIM, H2)
    w3, b3 = linear(k3, H2, H3)
    w4, b4 = linear(k4, H3, 1)

    # Pre-split W2 once (no per-call HBM->HBM slice copies).
    w2x, w2a = w2[:H1], w2[H1:]
    # Zero-pad layer 3 / 4 to 384 lanes (exact: pads stay zero).
    w3p = jnp.pad(w3, ((0, 0), (0, H3_PAD - H3)))
    b3p = jnp.pad(b3, ((0, 0), (0, H3_PAD - H3)))
    w4p = jnp.pad(w4, ((0, H3_PAD - H3), (0, 0))).T            # (1, H3_PAD)

    bf16 = jnp.bfloat16
    return {
        "w1": w1.astype(bf16), "b1": b1,
        "w2x": w2x.astype(bf16), "w2a": w2a.astype(bf16), "b2": b2,
        "w3": w3p.astype(bf16), "b3": b3p,
        "w4": w4p.astype(bf16), "b4": b4,
    }


def critic_ref(x, a, params):
    """Pure-JAX fp32 reference (uses the same bf16 weight values, upcast)."""
    f32 = jnp.float32
    w1 = params["w1"].astype(f32)
    w2x = params["w2x"].astype(f32)
    w2a = params["w2a"].astype(f32)
    w3 = params["w3"].astype(f32)
    w4 = params["w4"].astype(f32)
    b1, b2, b3, b4 = params["b1"], params["b2"], params["b3"], params["b4"]

    h1 = jax.nn.relu(x @ w1 + b1)
    h2 = jax.nn.relu(h1 @ w2x + a @ w2a + b2)   # == relu(cat([h1, a]) @ W2 + b2)
    h3 = jax.nn.relu(h2 @ w3 + b3)
    return jnp.sum(h3 * w4, axis=-1, keepdims=True) + b4


if __name__ == "__main__":
    key = jax.random.PRNGKey(0)
    kp, kx, ka = jax.random.split(key, 3)
    params = init_params(kp)

    # Inference-style small batch (B=8): single-block kernel.
    x = jax.random.normal(kx, (BATCH, OBS_DIM), jnp.float32)
    a = jax.random.normal(ka, (BATCH, ACTION_DIM), jnp.float32)
    q = jax.block_until_ready(critic_forward(x, a, params))
    q_expected = critic_ref(x, a, params)
    np.testing.assert_allclose(np.asarray(q), np.asarray(q_expected),
                               rtol=2e-2, atol=2e-2)
    assert q.shape == (BATCH, 1) and q.dtype == jnp.float32

    # Training-style batch (B=256): batch-parallel grid, weights VMEM-resident.
    kx2, ka2 = jax.random.split(kx)
    xb = jax.random.normal(kx2, (256, OBS_DIM), jnp.float32)
    ab = jax.random.normal(ka2, (256, ACTION_DIM), jnp.float32)
    qb = jax.block_until_ready(critic_forward(xb, ab, params, batch_tile=128))
    np.testing.assert_allclose(np.asarray(qb),
                               np.asarray(critic_ref(xb, ab, params)),
                               rtol=2e-2, atol=2e-2)
    assert qb.shape == (256, 1) and qb.dtype == jnp.float32

    print("KERNEL_OK")
</pallas_src>

<mosaic_0001>
module attributes {stable_mosaic.version = 11 : i64} {
  func.func @_critic_kernel(%arg0: memref<8x16xf32, #tpu.memory_space<vmem>>, %arg1: memref<8x4xf32, #tpu.memory_space<vmem>>, %arg2: memref<16x1024xbf16, #tpu.memory_space<vmem>>, %arg3: memref<1x1024xf32, #tpu.memory_space<vmem>>, %arg4: memref<1024x512xbf16, #tpu.memory_space<vmem>>, %arg5: memref<4x512xbf16, #tpu.memory_space<vmem>>, %arg6: memref<1x512xf32, #tpu.memory_space<vmem>>, %arg7: memref<512x384xbf16, #tpu.memory_space<vmem>>, %arg8: memref<1x384xf32, #tpu.memory_space<vmem>>, %arg9: memref<1x384xbf16, #tpu.memory_space<vmem>>, %arg10: memref<1x1xf32, #tpu.memory_space<vmem>>, %arg11: memref<8x1xf32, #tpu.memory_space<vmem>>) attributes {dimension_semantics = [], scalar_prefetch = 0 : i64, scratch_operands = 0 : i64, tpu.core_type = #tpu.core_type<tc>} {
    %c0 = arith.constant 0 : index
    %c0_0 = arith.constant 0 : index
    %0 = vector.load %arg0[%c0, %c0_0] : memref<8x16xf32, #tpu.memory_space<vmem>>, vector<8x16xf32>
    %1 = arith.truncf %0 : vector<8x16xf32> to vector<8x16xbf16>
    %c0_1 = arith.constant 0 : index
    %c0_2 = arith.constant 0 : index
    %2 = vector.load %arg2[%c0_1, %c0_2] : memref<16x1024xbf16, #tpu.memory_space<vmem>>, vector<16x1024xbf16>
    %cst = arith.constant dense<0.000000e+00> : vector<8x1024xf32>
    %3 = tpu.matmul %1, %2, %cst {dimension_numbers = #tpu.dot_dimension_numbers<[1], [0], [0], [1], [0, 0, 1, 1], [], []>} : vector<8x16xbf16>, vector<16x1024xbf16>, vector<8x1024xf32> -> vector<8x1024xf32>
    %c0_3 = arith.constant 0 : index
    %c0_4 = arith.constant 0 : index
    %4 = vector.load %arg3[%c0_3, %c0_4] : memref<1x1024xf32, #tpu.memory_space<vmem>>, vector<1x1024xf32>
    %5 = vector.broadcast %4 : vector<1x1024xf32> to vector<8x1024xf32>
    %6 = arith.addf %3, %5 : vector<8x1024xf32>
    %cst_5 = arith.constant 0.000000e+00 : f32
    %7 = vector.broadcast %cst_5 : f32 to vector<8x1024xf32>
    %8 = arith.maximumf %6, %7 : vector<8x1024xf32>
    %9 = arith.truncf %8 : vector<8x1024xf32> to vector<8x1024xbf16>
    %c0_6 = arith.constant 0 : index
    %c0_7 = arith.constant 0 : index
    %10 = vector.load %arg4[%c0_6, %c0_7] : memref<1024x512xbf16, #tpu.memory_space<vmem>>, vector<1024x512xbf16>
    %cst_8 = arith.constant dense<0.000000e+00> : vector<8x512xf32>
    %11 = tpu.matmul %9, %10, %cst_8 {dimension_numbers = #tpu.dot_dimension_numbers<[1], [0], [0], [1], [0, 0, 1, 1], [], []>} : vector<8x1024xbf16>, vector<1024x512xbf16>, vector<8x512xf32> -> vector<8x512xf32>
    %c0_9 = arith.constant 0 : index
    %c0_10 = arith.constant 0 : index
    %12 = vector.load %arg6[%c0_9, %c0_10] : memref<1x512xf32, #tpu.memory_space<vmem>>, vector<1x512xf32>
    %13 = vector.broadcast %12 : vector<1x512xf32> to vector<8x512xf32>
    %14 = arith.addf %11, %13 : vector<8x512xf32>
    %c0_11 = arith.constant 0 : index
    %c0_12 = arith.constant 0 : index
    %15 = vector.load %arg1[%c0_11, %c0_12] : memref<8x4xf32, #tpu.memory_space<vmem>>, vector<8x1xf32>
    %c0_13 = arith.constant 0 : index
    %c0_14 = arith.constant 0 : index
    %16 = vector.load %arg5[%c0_13, %c0_14] : memref<4x512xbf16, #tpu.memory_space<vmem>>, vector<1x512xbf16>
    %17 = arith.extf %16 : vector<1x512xbf16> to vector<1x512xf32>
    %18 = vector.broadcast %15 : vector<8x1xf32> to vector<8x512xf32>
    %19 = vector.broadcast %17 : vector<1x512xf32> to vector<8x512xf32>
    %20 = arith.mulf %18, %19 : vector<8x512xf32>
    %21 = arith.addf %14, %20 : vector<8x512xf32>
    %c0_15 = arith.constant 0 : index
    %c1 = arith.constant 1 : index
    %22 = vector.load %arg1[%c0_15, %c1] : memref<8x4xf32, #tpu.memory_space<vmem>>, vector<8x1xf32>
    %c1_16 = arith.constant 1 : index
    %c0_17 = arith.constant 0 : index
    %23 = vector.load %arg5[%c1_16, %c0_17] : memref<4x512xbf16, #tpu.memory_space<vmem>>, vector<1x512xbf16>
    %24 = arith.extf %23 : vector<1x512xbf16> to vector<1x512xf32>
    %25 = vector.broadcast %22 : vector<8x1xf32> to vector<8x512xf32>
    %26 = vector.broadcast %24 : vector<1x512xf32> to vector<8x512xf32>
    %27 = arith.mulf %25, %26 : vector<8x512xf32>
    %28 = arith.addf %21, %27 : vector<8x512xf32>
    %c0_18 = arith.constant 0 : index
    %c2 = arith.constant 2 : index
    %29 = vector.load %arg1[%c0_18, %c2] : memref<8x4xf32, #tpu.memory_space<vmem>>, vector<8x1xf32>
    %c2_19 = arith.constant 2 : index
    %c0_20 = arith.constant 0 : index
    %30 = vector.load %arg5[%c2_19, %c0_20] : memref<4x512xbf16, #tpu.memory_space<vmem>>, vector<1x512xbf16>
    %31 = arith.extf %30 : vector<1x512xbf16> to vector<1x512xf32>
    %32 = vector.broadcast %29 : vector<8x1xf32> to vector<8x512xf32>
    %33 = vector.broadcast %31 : vector<1x512xf32> to vector<8x512xf32>
    %34 = arith.mulf %32, %33 : vector<8x512xf32>
    %35 = arith.addf %28, %34 : vector<8x512xf32>
    %c0_21 = arith.constant 0 : index
    %c3 = arith.constant 3 : index
    %36 = vector.load %arg1[%c0_21, %c3] : memref<8x4xf32, #tpu.memory_space<vmem>>, vector<8x1xf32>
    %c3_22 = arith.constant 3 : index
    %c0_23 = arith.constant 0 : index
    %37 = vector.load %arg5[%c3_22, %c0_23] : memref<4x512xbf16, #tpu.memory_space<vmem>>, vector<1x512xbf16>
    %38 = arith.extf %37 : vector<1x512xbf16> to vector<1x512xf32>
    %39 = vector.broadcast %36 : vector<8x1xf32> to vector<8x512xf32>
    %40 = vector.broadcast %38 : vector<1x512xf32> to vector<8x512xf32>
    %41 = arith.mulf %39, %40 : vector<8x512xf32>
    %42 = arith.addf %35, %41 : vector<8x512xf32>
    %cst_24 = arith.constant 0.000000e+00 : f32
    %43 = vector.broadcast %cst_24 : f32 to vector<8x512xf32>
    %44 = arith.maximumf %42, %43 : vector<8x512xf32>
    %45 = arith.truncf %44 : vector<8x512xf32> to vector<8x512xbf16>
    %c0_25 = arith.constant 0 : index
    %c0_26 = arith.constant 0 : index
    %46 = vector.load %arg7[%c0_25, %c0_26] : memref<512x384xbf16, #tpu.memory_space<vmem>>, vector<512x384xbf16>
    %cst_27 = arith.constant dense<0.000000e+00> : vector<8x384xf32>
    %47 = tpu.matmul %45, %46, %cst_27 {dimension_numbers = #tpu.dot_dimension_numbers<[1], [0], [0], [1], [0, 0, 1, 1], [], []>} : vector<8x512xbf16>, vector<512x384xbf16>, vector<8x384xf32> -> vector<8x384xf32>
    %c0_28 = arith.constant 0 : index
    %c0_29 = arith.constant 0 : index
    %48 = vector.load %arg8[%c0_28, %c0_29] : memref<1x384xf32, #tpu.memory_space<vmem>>, vector<1x384xf32>
    %49 = vector.broadcast %48 : vector<1x384xf32> to vector<8x384xf32>
    %50 = arith.addf %47, %49 : vector<8x384xf32>
    %cst_30 = arith.constant 0.000000e+00 : f32
    %51 = vector.broadcast %cst_30 : f32 to vector<8x384xf32>
    %52 = arith.maximumf %50, %51 : vector<8x384xf32>
    %c0_31 = arith.constant 0 : index
    %c0_32 = arith.constant 0 : index
    %53 = vector.load %arg9[%c0_31, %c0_32] : memref<1x384xbf16, #tpu.memory_space<vmem>>, vector<1x384xbf16>
    %54 = arith.extf %53 : vector<1x384xbf16> to vector<1x384xf32>
    %55 = vector.broadcast %54 : vector<1x384xf32> to vector<8x384xf32>
    %56 = arith.mulf %52, %55 : vector<8x384xf32>
    %cst_33 = arith.constant dense<0.000000e+00> : vector<8xf32>
    %57 = vector.multi_reduction <add>, %56, %cst_33 [1] : vector<8x384xf32> to vector<8xf32>
    %58 = vector.shape_cast %57 : vector<8xf32> to vector<8x1xf32>
    %c0_34 = arith.constant 0 : index
    %c0_35 = arith.constant 0 : index
    %59 = vector.load %arg10[%c0_34, %c0_35] : memref<1x1xf32, #tpu.memory_space<vmem>>, vector<1x1xf32>
    %60 = vector.broadcast %59 : vector<1x1xf32> to vector<8x1xf32>
    %61 = arith.addf %58, %60 : vector<8x1xf32>
    %c0_36 = arith.constant 0 : index
    %c0_37 = arith.constant 0 : index
    %62 = vector.load %arg11[%c0_36, %c0_37] : memref<8x1xf32, #tpu.memory_space<vmem>>, vector<8x1xf32>
    tpu.vector_store %arg11[%c0_36, %c0_37], %61 {strides = array<i32>} : memref<8x1xf32, #tpu.memory_space<vmem>>, vector<8x1xf32>,
    return
  }
}

</mosaic_0001>

<bundles_post_ra>
// kernel: tpu_custom_call.1
= control target key start
LH: loop header
LB: loop body
LE: loop exit
PB: predicated region body
PF: predicated region fallthrough
CT: control target
= control target key end

     0   :  { %s4685_s0 = inlined_call_operand.vmem [shape: f32[8,16], index: 0, kind: input, shape index: {}]   ;;  %s4686_s1 = inlined_call_operand.vmem [shape: f32[8,4], index: 1, kind: input, shape index: {}]   ;;  %s4687_s2 = inlined_call_operand.hbm [shape: bf16[16,1024], index: 2, kind: input, shape index: {}]   ;;  %s4688_s3 = inlined_call_operand.vmem [shape: f32[1,1024], index: 3, kind: input, shape index: {}]   ;;  %s4689_s4 = inlined_call_operand.hbm [shape: bf16[1024,512], index: 4, kind: input, shape index: {}]   ;;  %s4690_s5 = inlined_call_operand.hbm [shape: bf16[4,512], index: 5, kind: input, shape index: {}]   ;;  %s4691_s6 = inlined_call_operand.vmem [shape: f32[1,512], index: 6, kind: input, shape index: {}]   ;;  %s4692_s7 = inlined_call_operand.hbm [shape: bf16[512,384], index: 7, kind: input, shape index: {}]   ;;  %s4693_s8 = inlined_call_operand.vmem [shape: f32[1,384], index: 8, kind: input, shape index: {}]   ;;  %s4694_s9 = inlined_call_operand.vmem [shape: bf16[1,384], index: 9, kind: input, shape index: {}]   ;;  %s4695_s10 = inlined_call_operand.<no memory space> [shape: f32[1,1], index: 10, kind: input, shape index: {}]   ;;  %s4696_s11 = inlined_call_operand.vmem [shape: f32[8,1], index: 11, kind: output, shape index: {}]  }
   0x1   :  { %v16_v0 = vstv %s4695_s10 }
   0x2   :  { %17 = vst [vmem:[#allocation2] sm:$0x1] %v16_v0 }
   0x3   :  { %18 = vsyncpa [#allocation4], 0 }
   0x4   :  { %19 = vsyncpa [#allocation6], 0 }
   0x5   :  { %20 = vsyncpa [#allocation9], 0  ;;  %s4370_s19 = smov [#allocation5]  }
   0x6   :  { %s44_s20 = sshll.u32 %s4370_s19, 4  ;;  %s45_s20 = int_to_ptr.vmem [resolvable:$true] %s44_s20 }
   0x7   :  { %s4292_s21 = scalar_lea.vmem %s45_s20, 32768  ;;  %p4297_p1 = scmp.lt.s32.totalorder %s45_s20, %s45_s20 }
   0x8   :  { %p4293_p0 = scmp.ne.s32.totalorder %s45_s20, %s4292_s21  ;;  %p4298_p2 = scmp.lt.s32.totalorder %s4292_s21, %s4292_s21 }
   0xa   :  { %p4299_p3 = por %p4298_p2, %p4297_p1 }
   0xc   :  { %p4300_p4 = pnand %p4299_p3, %p4293_p0 }
   0xe   :  { %4303 = shalt.err (!%p4300_p4)
}
   0xf   :  { %s4371_s22 = smov 256   ;;  %s4372_s23 = smov 16  }
  0x10   :  { %50 = dma.hbm_to_vmem [thread:$0]  %s4689_s4, 32768, %s45_s20, [#allocation6], %s4371_s22, %s4371_s22, %s4372_s23  }
  0x11   :  { %s4373_s10 = smov [#allocation3]  }
  0x12   :  { %s30_s26 = sshll.u32 %s4373_s10, 4  ;;  %s31_s26 = int_to_ptr.vmem [resolvable:$true] %s30_s26 }
  0x13   :  { %s4312_s27 = scalar_lea.vmem %s31_s26, 1024  ;;  %p4317_p6 = scmp.lt.s32.totalorder %s31_s26, %s31_s26 }
  0x14   :  { %p4313_p5 = scmp.ne.s32.totalorder %s31_s26, %s4312_s27  ;;  %p4318_p7 = scmp.lt.s32.totalorder %s4312_s27, %s4312_s27 }
  0x16   :  { %p4319_p8 = por %p4318_p7, %p4317_p6 }
  0x18   :  { %p4320_p9 = pnand %p4319_p8, %p4313_p5 }
  0x1a   :  { %4323 = shalt.err (!%p4320_p9)
}
  0x1b   :  { %s4374_s28 = smov 512   ;;  %s4375_s29 = smov 32  }
  0x1c   :  { %36 = dma.hbm_to_vmem [thread:$0]  %s4687_s2, 1024, %s31_s26, [#allocation4], %s4374_s28, %s4374_s28, %s4375_s29  }
  0x1d   :  { %s4376_s13 = smov [#allocation7]   ;;  %s4377_s15 = smov [#allocation8]  }
  0x1e   :  { %s57_s14 = sshll.u32 %s4376_s13, 4  ;;  %s68_s4 = sshll.u32 %s4377_s15, 4  ;;  %s58_s14 = int_to_ptr.vmem [resolvable:$true] %s57_s14  ;;  %s69_s4 = int_to_ptr.vmem [resolvable:$true] %s68_s4 }
  0x1f   :  { %s4332_s16 = scalar_lea.vmem %s58_s14, 128  ;;  %p4337_p11 = scmp.lt.s32.totalorder %s58_s14, %s58_s14 }
  0x20   :  { %p4333_p10 = scmp.ne.s32.totalorder %s58_s14, %s4332_s16  ;;  %p4338_p12 = scmp.lt.s32.totalorder %s4332_s16, %s4332_s16 }
  0x22   :  { %p4339_p13 = por %p4338_p12, %p4337_p11 }
  0x24   :  { %p4340_p0 = pnand %p4339_p13, %p4333_p10 }
  0x26   :  { %4343 = shalt.err (!%p4340_p0)
}
  0x27   :  { %60 = dma.hbm_to_vmem [thread:$0]  %s4690_s5, 128, %s58_s14, [#allocation6]  }
  0x28   :  { %s4352_s19 = scalar_lea.vmem %s69_s4, 12288  ;;  %p4357_p2 = scmp.lt.s32.totalorder %s69_s4, %s69_s4 }
  0x29   :  { %p4353_p1 = scmp.ne.s32.totalorder %s69_s4, %s4352_s19  ;;  %p4358_p3 = scmp.lt.s32.totalorder %s4352_s19, %s4352_s19 }
  0x2b   :  { %p4359_p4 = por %p4358_p3, %p4357_p2 }
  0x2d   :  { %p4360_p5 = pnand %p4359_p4, %p4353_p1 }
  0x2f   :  { %4363 = shalt.err (!%p4360_p5)
}
  0x30   :  { %s4378_s2 = smov 192   ;;  %s4379_s20 = smov 12  }
  0x31   :  { %74 = dma.hbm_to_vmem [thread:$0]  %s4692_s7, 12288, %s69_s4, [#allocation9], %s4378_s2, %s4378_s2, %s4379_s20  }
  0x32   :  { %4364 = dma.done.wait [#allocation4], 1024  }
  0x33   :  { %4365 = vsyncadd [#allocation4], 4294966272 }
  0x34   :  { %4366 = dma.done.wait [#allocation6], 32896  }
  0x35   :  { %4367 = vsyncadd [#allocation6], 4294934400 }
  0x36   :  { %4368 = dma.done.wait [#allocation9], 12288  }
  0x37   :  { %4369 = vsyncadd [#allocation9], 4294955008  ;;  %v4380_v1 = vmov 0   ;;  %v96_v2 = vld [vmem:[#allocation3] sm:$0xff]  ;;  %v97_v4 = vld [vmem:[#allocation3 + $0x8] sm:$0xff]  ;;  %vm186_vm0 = vcmask 130048  }
  0x38   :  { %222 = vmatprep.mubr.bf16.mxu0 %v4380_v1  ;;  %263 = vmatprep.mubr.bf16.mxu1 %v4380_v1  ;;  %v100_v3 = vld [vmem:[#allocation3 + $0x20] sm:$0xff]  ;;  %v101_v6 = vld [vmem:[#allocation3 + $0x28] sm:$0xff]  ;;  %v98_v9 = vld [vmem:[#allocation3 + $0x10] sm:$0xff]  ;;  %vm3335_vm1 = vcmask 7168  }
  0x39   :  { %3767 = vset.pattern.permute.xlu0 %v4380_v1  ;;  %v3345_v5 = vcombine.high %v96_v2, %v100_v3  ;;  %v3344_v7 = vcombine.low %v96_v2, %v100_v3  ;;  %v94_v8 = vld [vmem:[%s4685_s0] sm:$0xff]  ;;  %v3347_v10 = vcombine.high %v97_v4, %v101_v6  ;;  %v3346_v11 = vcombine.low %v97_v4, %v101_v6  ;;  %v102_v12 = vld [vmem:[#allocation3 + $0x30] sm:$0xff] }
  0x3a   :  { %v99_v13 = vld [vmem:[#allocation3 + $0x18] sm:$0xff]  ;;  %v95_v15 = vpack.c.bf16 %v94_v8, %v94_v8  ;;  %v3349_v16 = vcombine.high %v98_v9, %v102_v12  ;;  %v3348_v18 = vcombine.low %v98_v9, %v102_v12  ;;  %v3774_v20 = vld [vmem:[#allocation5 + $0xe4] ss:$16 sps:$4 sm:$0xff]   ;;  %v3772_v22 = vld [vmem:[#allocation5 + $0xe0] ss:$16 sps:$4 sm:$0xff]  }
  0x3b   :  { %v103_v14 = vld [vmem:[#allocation3 + $0x38] sm:$0xff]  ;;  %204 = vmatprep.subr.bf16.mxu0 %v3345_v5  ;;  %245 = vmatprep.subr.bf16.mxu1 %v3347_v10  ;;  %v3777_v21 = vld [vmem:[#allocation5 + $0x2e4] ss:$16 sps:$4 sm:$0xff]   ;;  %v3775_v23 = vld [vmem:[#allocation5 + $0x2e0] ss:$16 sps:$4 sm:$0xff]  }
  0x3c   :  { %v3351_v17 = vcombine.high %v99_v13, %v103_v14  ;;  %205 = vmatpush1.bf16.msra.mxu0 %v3344_v7  ;;  %246 = vmatpush1.bf16.msra.mxu1 %v3346_v11  ;;  %v3350_v19 = vcombine.low %v99_v13, %v103_v14  ;;  %v3780_v24 = vld [vmem:[#allocation5 + $0xc4] ss:$16 sps:$4 sm:$0xff]   ;;  %v3778_v26 = vld [vmem:[#allocation5 + $0xc0] ss:$16 sps:$4 sm:$0xff]  }
  0x3d   :  { %286 = vmatprep.subr.bf16.mxu0 %v3349_v16  ;;  %v3783_v25 = vld [vmem:[#allocation5 + $0x2c4] ss:$16 sps:$4 sm:$0xff]   ;;  %v3781_v27 = vld [vmem:[#allocation5 + $0x2c0] ss:$16 sps:$4 sm:$0xff]  }
  0x3e   :  { %327 = vmatprep.subr.bf16.mxu1 %v3351_v17  ;;  %v3786_v28 = vld [vmem:[#allocation5 + $0xa4] ss:$16 sps:$4 sm:$0xff]   ;;  %v3784_v30 = vld [vmem:[#allocation5 + $0xa0] ss:$16 sps:$4 sm:$0xff]  }
  0x3f   :  { %3352 = vmatmul.mubr.msk.bf16.vlgmr.msra.gmra.mxu0 %vm186_vm0, %v95_v15  ;;  %3353 = vmatmul.mubr.msk.bf16.vlgmr.msra.gmra.mxu1 %vm186_vm0, %v95_v15  ;;  %v3789_v29 = vld [vmem:[#allocation5 + $0x2a4] ss:$16 sps:$4 sm:$0xff]   ;;  %v3787_v31 = vld [vmem:[#allocation5 + $0x2a0] ss:$16 sps:$4 sm:$0xff]  }
  0x40   :  { %287 = vmatpush1.bf16.msra.mxu0 %v3348_v18  ;;  %304 = vmatprep.mubr.bf16.mxu0 %v4380_v1  ;;  %v3792_v32 = vld [vmem:[#allocation5 + $0x84] ss:$16 sps:$4 sm:$0xff]   ;;  %v3790_v34 = vld [vmem:[#allocation5 + $0x80] ss:$16 sps:$4 sm:$0xff]  }
  0x41   :  { %328 = vmatpush1.bf16.msra.mxu1 %v3350_v19  ;;  %345 = vmatprep.mubr.bf16.mxu1 %v4380_v1  ;;  %v3795_v33 = vld [vmem:[#allocation5 + $0x284] ss:$16 sps:$4 sm:$0xff]   ;;  %v3793_v35 = vld [vmem:[#allocation5 + $0x280] ss:$16 sps:$4 sm:$0xff]  }
  0x42   :  { %1928 = vmatprep.subr.bf16.mxu0 %v3774_v20  ;;  %1969 = vmatprep.subr.bf16.mxu1 %v3777_v21  ;;  %v3798_v36 = vld [vmem:[#allocation5 + $0x64] ss:$16 sps:$4 sm:$0xff]   ;;  %v3796_v38 = vld [vmem:[#allocation5 + $0x60] ss:$16 sps:$4 sm:$0xff]  }
  0x43   :  { %v3801_v37 = vld [vmem:[#allocation5 + $0x264] ss:$16 sps:$4 sm:$0xff]   ;;  %v3799_v39 = vld [vmem:[#allocation5 + $0x260] ss:$16 sps:$4 sm:$0xff]  }
  0x44   :  { %v3804_v40 = vld [vmem:[#allocation5 + $0x44] ss:$16 sps:$4 sm:$0xff]   ;;  %v3802_v42 = vld [vmem:[#allocation5 + $0x40] ss:$16 sps:$4 sm:$0xff]  }
  0x45   :  { %v3807_v41 = vld [vmem:[#allocation5 + $0x244] ss:$16 sps:$4 sm:$0xff]   ;;  %v3805_v43 = vld [vmem:[#allocation5 + $0x240] ss:$16 sps:$4 sm:$0xff]  }
  0x46   :  { %v3810_v44 = vld [vmem:[#allocation5 + $0x24] ss:$16 sps:$4 sm:$0xff]   ;;  %v3808_v46 = vld [vmem:[#allocation5 + $0x20] ss:$16 sps:$4 sm:$0xff]  }
  0x47   :  { %3354 = vmatmul.mubr.msk.bf16.vlgmr.msra.gmra.mxu0 %vm186_vm0, %v95_v15  ;;  %3355 = vmatmul.mubr.msk.bf16.vlgmr.msra.gmra.mxu1 %vm186_vm0, %v95_v15  ;;  %v3813_v45 = vld [vmem:[#allocation5 + $0x224] ss:$16 sps:$4 sm:$0xff]   ;;  %v3811_v47 = vld [vmem:[#allocation5 + $0x220] ss:$16 sps:$4 sm:$0xff]  }
  0x48   :  { %1929 = vmatpush1.bf16.msra.mxu0 %v3772_v22  ;;  %1970 = vmatpush1.bf16.msra.mxu1 %v3775_v23  ;;  %v3816_v48 = vld [vmem:[#allocation5 + $0x4] ss:$16 sps:$4 sm:$0xff]   ;;  %v3814_v49 = vld [vmem:[#allocation5] ss:$16 sps:$4 sm:$0xff]   ;;  %v106_v22 = vlaneseq }
  0x49   :  { %1930 = vmatprep.subr.bf16.mxu0 %v3780_v24  ;;  %1971 = vmatprep.subr.bf16.mxu1 %v3783_v25  ;;  %v3819_v50 = vld [vmem:[#allocation5 + $0x204] ss:$16 sps:$4 sm:$0xff]   ;;  %v3817_v51 = vld [vmem:[#allocation5 + $0x200] ss:$16 sps:$4 sm:$0xff]  }
  0x4a   :  { %v3822_v52 = vld [vmem:[#allocation5 + $0x1e4] ss:$16 sps:$4 sm:$0xff]   ;;  %v3820_v54 = vld [vmem:[#allocation5 + $0x1e0] ss:$16 sps:$4 sm:$0xff]   ;;  %v4466_v23 = vshrl.u32 %v106_v22, 7 }
  0x4b   :  { %v3825_v53 = vld [vmem:[#allocation5 + $0x3e4] ss:$16 sps:$4 sm:$0xff]   ;;  %v3823_v55 = vld [vmem:[#allocation5 + $0x3e0] ss:$16 sps:$4 sm:$0xff]  }
  0x4c   :  { %1931 = vmatpush1.bf16.msra.mxu0 %v3778_v26  ;;  %1972 = vmatpush1.bf16.msra.mxu1 %v3781_v27  ;;  %v3828_v56 = vld [vmem:[#allocation5 + $0x1c4] ss:$16 sps:$4 sm:$0xff]   ;;  %v3826_v58 = vld [vmem:[#allocation5 + $0x1c0] ss:$16 sps:$4 sm:$0xff]   ;;  %v4469_v24 = vsub.s32 0, %v4466_v23  ;;  %v4477_v26 = vsub.s32 2, %v4466_v23 }
  0x4d   :  { %1932 = vmatprep.subr.bf16.mxu0 %v3786_v28  ;;  %1973 = vmatprep.subr.bf16.mxu1 %v3789_v29  ;;  %v3831_v57 = vld [vmem:[#allocation5 + $0x3c4] ss:$16 sps:$4 sm:$0xff]   ;;  %v3829_v59 = vld [vmem:[#allocation5 + $0x3c0] ss:$16 sps:$4 sm:$0xff]   ;;  %v4480_v27 = vsub.s32 1, %v4466_v23  ;;  %v4483_v28 = vsub.s32 3, %v4466_v23 }
  0x4e   :  { %v3834_v60 = vld [vmem:[#allocation5 + $0x1a4] ss:$16 sps:$4 sm:$0xff]   ;;  %v3832_v62 = vld [vmem:[#allocation5 + $0x1a0] ss:$16 sps:$4 sm:$0xff]  }
  0x4f   :  { %v3837_v61 = vld [vmem:[#allocation5 + $0x3a4] ss:$16 sps:$4 sm:$0xff]   ;;  %v3835_v63 = vld [vmem:[#allocation5 + $0x3a0] ss:$16 sps:$4 sm:$0xff]  }
  0x50   :  { %1933 = vmatpush1.bf16.msra.mxu0 %v3784_v30  ;;  %1974 = vmatpush1.bf16.msra.mxu1 %v3787_v31  ;;  %v3840_v0 = vld [vmem:[#allocation5 + $0x184] ss:$16 sps:$4 sm:$0xff]   ;;  %v3838_v2 = vld [vmem:[#allocation5 + $0x180] ss:$16 sps:$4 sm:$0xff]  }
  0x51   :  { %1934 = vmatprep.subr.bf16.mxu0 %v3792_v32  ;;  %1975 = vmatprep.subr.bf16.mxu1 %v3795_v33  ;;  %v3843_v1 = vld [vmem:[#allocation5 + $0x384] ss:$16 sps:$4 sm:$0xff]   ;;  %v3841_v3 = vld [vmem:[#allocation5 + $0x380] ss:$16 sps:$4 sm:$0xff]  }
  0x52   :  { %v3846_v4 = vld [vmem:[#allocation5 + $0x164] ss:$16 sps:$4 sm:$0xff]   ;;  %v3844_v6 = vld [vmem:[#allocation5 + $0x160] ss:$16 sps:$4 sm:$0xff]  }
  0x53   :  { %v3849_v5 = vld [vmem:[#allocation5 + $0x364] ss:$16 sps:$4 sm:$0xff]   ;;  %v3847_v7 = vld [vmem:[#allocation5 + $0x360] ss:$16 sps:$4 sm:$0xff]  }
  0x54   :  { %1935 = vmatpush1.bf16.msra.mxu0 %v3790_v34  ;;  %1976 = vmatpush1.bf16.msra.mxu1 %v3793_v35  ;;  %v3852_v8 = vld [vmem:[#allocation5 + $0x144] ss:$16 sps:$4 sm:$0xff]   ;;  %v3850_v10 = vld [vmem:[#allocation5 + $0x140] ss:$16 sps:$4 sm:$0xff]  }
  0x55   :  { %1936 = vmatprep.subr.bf16.mxu0 %v3798_v36  ;;  %1977 = vmatprep.subr.bf16.mxu1 %v3801_v37  ;;  %v3855_v9 = vld [vmem:[#allocation5 + $0x344] ss:$16 sps:$4 sm:$0xff]   ;;  %v3853_v11 = vld [vmem:[#allocation5 + $0x340] ss:$16 sps:$4 sm:$0xff]  }
  0x56   :  { %v3858_v12 = vld [vmem:[#allocation5 + $0x124] ss:$16 sps:$4 sm:$0xff]   ;;  %v3856_v14 = vld [vmem:[#allocation5 + $0x120] ss:$16 sps:$4 sm:$0xff]  }
  0x57   :  { %v3861_v13 = vld [vmem:[#allocation5 + $0x324] ss:$16 sps:$4 sm:$0xff]   ;;  %v3859_v15 = vld [vmem:[#allocation5 + $0x320] ss:$16 sps:$4 sm:$0xff]  }
  0x58   :  { %1937 = vmatpush1.bf16.msra.mxu0 %v3796_v38  ;;  %1978 = vmatpush1.bf16.msra.mxu1 %v3799_v39  ;;  %v3864_v16 = vld [vmem:[#allocation5 + $0x104] ss:$16 sps:$4 sm:$0xff]   ;;  %v3862_v18 = vld [vmem:[#allocation5 + $0x100] ss:$16 sps:$4 sm:$0xff]  }
  0x59   :  { %1938 = vmatprep.subr.bf16.mxu0 %v3804_v40  ;;  %1979 = vmatprep.subr.bf16.mxu1 %v3807_v41  ;;  %v3867_v17 = vld [vmem:[#allocation5 + $0x304] ss:$16 sps:$4 sm:$0xff]   ;;  %v3865_v19 = vld [vmem:[#allocation5 + $0x300] ss:$16 sps:$4 sm:$0xff]   ;;  %v4494_v40 = vsub.s32 5, %v4466_v23 }
  0x5a   :  { %v3870_v20 = vld [vmem:[#allocation5 + $0x4e4] ss:$16 sps:$4 sm:$0xff]   ;;  %v3889_v22 = vld [vmem:[#allocation5 + $0x680] ss:$16 sps:$4 sm:$0xff]  }
  0x5b   :  { %v3873_v21 = vld [vmem:[#allocation5 + $0x6e4] ss:$16 sps:$4 sm:$0xff]  }
  0x5c   :  { %1939 = vmatpush1.bf16.msra.mxu0 %v3802_v42  ;;  %1980 = vmatpush1.bf16.msra.mxu1 %v3805_v43  ;;  %v4474_v25 = vld [vmem:[%s4688_s3] sm:$0xff] }
  0x5d   :  { %1940 = vmatprep.subr.bf16.mxu0 %v3810_v44  ;;  %1981 = vmatprep.subr.bf16.mxu1 %v3813_v45  ;;  %v109_v29 = vrot.slane %v4474_v25, %v4469_v24  ;;  %v117_v30 = vrot.slane %v4474_v25, %v4477_v26  ;;  %v113_v31 = vrot.slane %v4474_v25, %v4480_v27  ;;  %v4497_v45 = vsub.s32 7, %v4466_v23 }
  0x5e   :  { %v121_v33 = vrot.slane %v4474_v25, %v4483_v28 }
  0x60   :  { %1941 = vmatpush1.bf16.msra.mxu0 %v3808_v46  ;;  %1982 = vmatpush1.bf16.msra.mxu1 %v3811_v47 }
  0x61   :  { %1942 = vmatprep.subr.bf16.mxu0 %v3816_v48  ;;  %1983 = vmatprep.subr.bf16.mxu1 %v3819_v50 }
  0x64   :  { %1943 = vmatpush1.bf16.msra.mxu0 %v3814_v49  ;;  %1984 = vmatpush1.bf16.msra.mxu1 %v3817_v51 }
  0x65   :  { %1944 = vmatprep.subr.bf16.mxu0 %v3822_v52  ;;  %1985 = vmatprep.subr.bf16.mxu1 %v3825_v53  ;;  %v3868_v53 = vld [vmem:[#allocation5 + $0x4e0] ss:$16 sps:$4 sm:$0xff]  }
  0x68   :  { %1945 = vmatpush2.bf16.msra.mxu0 %v3820_v54  ;;  %1986 = vmatpush2.bf16.msra.mxu1 %v3823_v55  ;;  %v129_v54 = vrot.slane %v4474_v25, %v4494_v40 }
  0x69   :  { %1946 = vmatprep.subr.bf16.mxu0 %v3828_v56  ;;  %1987 = vmatprep.subr.bf16.mxu1 %v3831_v57  ;;  %v3871_v57 = vld [vmem:[#allocation5 + $0x6e0] ss:$16 sps:$4 sm:$0xff]  }
  0x6c   :  { %1947 = vmatpush2.bf16.msra.mxu0 %v3826_v58  ;;  %1988 = vmatpush2.bf16.msra.mxu1 %v3829_v59  ;;  %v3876_v58 = vld [vmem:[#allocation5 + $0x4c4] ss:$16 sps:$4 sm:$0xff]  }
  0x6d   :  { %1948 = vmatprep.subr.bf16.mxu0 %v3834_v60  ;;  %1989 = vmatprep.subr.bf16.mxu1 %v3837_v61  ;;  %v137_v60 = vrot.slane %v4474_v25, %v4497_v45  ;;  %v3879_v61 = vld [vmem:[#allocation5 + $0x6c4] ss:$16 sps:$4 sm:$0xff]  }
  0x70   :  { %1949 = vmatpush2.bf16.msra.mxu0 %v3832_v62  ;;  %1990 = vmatpush2.bf16.msra.mxu1 %v3835_v63 }
  0x71   :  { %1950 = vmatprep.subr.bf16.mxu0 %v3840_v0  ;;  %1991 = vmatprep.subr.bf16.mxu1 %v3843_v1  ;;  %v3874_v0 = vld [vmem:[#allocation5 + $0x4c0] ss:$16 sps:$4 sm:$0xff]  }
  0x74   :  { %1951 = vmatpush2.bf16.msra.mxu0 %v3838_v2  ;;  %1992 = vmatpush2.bf16.msra.mxu1 %v3841_v3  ;;  %v3877_v3 = vld [vmem:[#allocation5 + $0x6c0] ss:$16 sps:$4 sm:$0xff]  }
  0x75   :  { %1952 = vmatprep.subr.bf16.mxu0 %v3846_v4  ;;  %1993 = vmatprep.subr.bf16.mxu1 %v3849_v5  ;;  %v3882_v4 = vld [vmem:[#allocation5 + $0x4a4] ss:$16 sps:$4 sm:$0xff]  }
  0x78   :  { %1953 = vmatpush2.bf16.msra.mxu0 %v3844_v6  ;;  %1994 = vmatpush2.bf16.msra.mxu1 %v3847_v7  ;;  %v3885_v7 = vld [vmem:[#allocation5 + $0x6a4] ss:$16 sps:$4 sm:$0xff]  }
  0x79   :  { %1954 = vmatprep.subr.bf16.mxu0 %v3852_v8  ;;  %1995 = vmatprep.subr.bf16.mxu1 %v3855_v9 }
  0x7c   :  { %1955 = vmatpush2.bf16.msra.mxu0 %v3850_v10  ;;  %1996 = vmatpush2.bf16.msra.mxu1 %v3853_v11  ;;  %v2256_v10 = vld [vmem:[%s4686_s1] sm:$0xff] }
  0x7d   :  { %1956 = vmatprep.subr.bf16.mxu0 %v3858_v12  ;;  %1997 = vmatprep.subr.bf16.mxu1 %v3861_v13  ;;  %v3880_v13 = vld [vmem:[#allocation5 + $0x4a0] ss:$16 sps:$4 sm:$0xff]  }
  0x7e   :  { %2262 = vperm.xlu0 %3767, %v2256_v10  }
  0x80   :  { %1957 = vmatpush2.bf16.msra.mxu0 %v3856_v14  ;;  %1998 = vmatpush2.bf16.msra.mxu1 %v3859_v15 }
  0x81   :  { %1958 = vmatprep.subr.bf16.mxu0 %v3864_v16  ;;  %1999 = vmatprep.subr.bf16.mxu1 %v3867_v17  ;;  %v3883_v16 = vld [vmem:[#allocation5 + $0x6a0] ss:$16 sps:$4 sm:$0xff]   ;;  %v3888_v17 = vld [vmem:[#allocation5 + $0x484] ss:$16 sps:$4 sm:$0xff]  }
  0x84   :  { %1959 = vmatpush2.bf16.msra.mxu0 %v3862_v18  ;;  %2000 = vmatpush2.bf16.msra.mxu1 %v3865_v19  ;;  %v3891_v19 = vld [vmem:[#allocation5 + $0x684] ss:$16 sps:$4 sm:$0xff]  }
  0x85   :  { %2010 = vmatprep.subr.bf16.mxu0 %v3870_v20  ;;  %2051 = vmatprep.subr.bf16.mxu1 %v3873_v21  ;;  %v4381_v20 = vmov 2   ;;  %v3886_v21 = vld [vmem:[#allocation5 + $0x480] ss:$16 sps:$4 sm:$0xff]  }
  0x86   :  { %3769 = vset.pattern.permute.xlu1 %v4381_v20  ;;  %v3949_v20 = vld [vmem:[#allocation5 + $0x740] ss:$16 sps:$4 sm:$0xff]  }
  0x87   :  { %2363 = vperm.xlu1 %3769, %v2256_v10  }
  0xff   :  { %v224_v32 = vpop.f32.mrf.mxu0  ;;  %v265_v35 = vpop.f32.mrf.mxu1 }
 0x100   :  { %v225_v34 = vadd.f32 %v224_v32, %v109_v29  ;;  %v266_v36 = vadd.f32 %v265_v35, %v117_v30  ;;  %v3894_v29 = vld [vmem:[#allocation5 + $0x464] ss:$16 sps:$4 sm:$0xff]   ;;  %v3892_v32 = vld [vmem:[#allocation5 + $0x460] ss:$16 sps:$4 sm:$0xff]  }
 0x101   :  { %v226_v37 = vpop.f32.mrf.mxu0  ;;  %v267_v39 = vpop.f32.mrf.mxu1  ;;  %v3897_v30 = vld [vmem:[#allocation5 + $0x664] ss:$16 sps:$4 sm:$0xff]  }
 0x102   :  { %v227_v38 = vadd.f32 %v226_v37, %v113_v31  ;;  %v354_v41 = vmax.f32 %v225_v34, 0.0  ;;  %v356_v42 = vmax.f32 %v266_v36, 0.0  ;;  %v268_v43 = vadd.f32 %v267_v39, %v121_v33  ;;  %v3895_v34 = vld [vmem:[#allocation5 + $0x660] ss:$16 sps:$4 sm:$0xff]   ;;  %v3900_v35 = vld [vmem:[#allocation5 + $0x444] ss:$16 sps:$4 sm:$0xff]  }
 0x103   :  { %v228_v44 = vpop.f32.mrf.mxu0  ;;  %v269_v47 = vpop.f32.mrf.mxu1  ;;  %v4382_v31 = vmov 1   ;;  %v4383_v33 = vmov 3   ;;  %v3903_v36 = vld [vmem:[#allocation5 + $0x644] ss:$16 sps:$4 sm:$0xff]   ;;  %v3898_v37 = vld [vmem:[#allocation5 + $0x440] ss:$16 sps:$4 sm:$0xff]  }
 0x104   :  { %v355_v46 = vmax.f32 %v227_v38, 0.0  ;;  %v357_v48 = vmax.f32 %v268_v43, 0.0  ;;  %v4499_v50 = vpack.c.bf16 %v356_v42, %v356_v42  ;;  %v4505_v55 = vpack.c.bf16 %v354_v41, %v354_v41  ;;  %3768 = vset.pattern.permute.xlu0 %v4382_v31  ;;  %3770 = vset.pattern.permute.xlu1 %v4383_v33  ;;  %v3901_v38 = vld [vmem:[#allocation5 + $0x640] ss:$16 sps:$4 sm:$0xff]   ;;  %v3906_v39 = vld [vmem:[#allocation5 + $0x424] ss:$16 sps:$4 sm:$0xff]  }
 0x105   :  { %v229_v49 = vpop.f32.mrf.mxu0  ;;  %v270_v52 = vpop.f32.mrf.mxu1  ;;  %2312 = vperm.xlu0 %3768, %v2256_v10   ;;  %2413 = vperm.xlu1 %3770, %v2256_v10   ;;  %v3909_v41 = vld [vmem:[#allocation5 + $0x624] ss:$16 sps:$4 sm:$0xff]   ;;  %v3904_v42 = vld [vmem:[#allocation5 + $0x420] ss:$16 sps:$4 sm:$0xff]   ;;  %v4529_v10 = vsub.s32 6, %v4466_v23 }
 0x106   :  { %v4501_v51 = vpack.c.bf16 %v355_v46, %v355_v46  ;;  %v4507_v56 = vpack.c.bf16 %v357_v48, %v357_v48  ;;  %v3907_v43 = vld [vmem:[#allocation5 + $0x620] ss:$16 sps:$4 sm:$0xff]   ;;  %v3912_v44 = vld [vmem:[#allocation5 + $0x404] ss:$16 sps:$4 sm:$0xff]  }
 0x107   :  { %v4509_v59 = vpop.f32.mrf.mxu0  ;;  %v4514_v62 = vpop.f32.mrf.mxu1  ;;  %v3915_v46 = vld [vmem:[#allocation5 + $0x604] ss:$16 sps:$4 sm:$0xff]   ;;  %v3910_v47 = vld [vmem:[#allocation5 + $0x400] ss:$16 sps:$4 sm:$0xff]  }
 0x108   :  { %1960 = vmatprep.mubr.bf16.mxu0 %v4501_v51  ;;  %2001 = vmatprep.mubr.bf16.mxu1 %v4507_v56  ;;  %v3913_v48 = vld [vmem:[#allocation5 + $0x600] ss:$16 sps:$4 sm:$0xff]   ;;  %v3918_v49 = vld [vmem:[#allocation5 + $0x5e4] ss:$16 sps:$4 sm:$0xff]  }
 0x109   :  { %1961 = vmatmul.mubr.bf16.vlgmr.msra.gmra.mxu0 %v4505_v55  ;;  %v308_v63 = vpop.f32.mrf.mxu0  ;;  %2002 = vmatmul.mubr.bf16.vlgmr.msra.gmra.mxu1 %v4499_v50  ;;  %v349_v2 = vpop.f32.mrf.mxu1  ;;  %v3921_v52 = vld [vmem:[#allocation5 + $0x7e4] ss:$16 sps:$4 sm:$0xff]   ;;  %v3955_v31 = vld [vmem:[#allocation5 + $0x720] ss:$16 sps:$4 sm:$0xff]  }
 0x10a   :  { %2011 = vmatpush1.bf16.msra.mxu0 %v3868_v53  ;;  %v309_v1 = vadd.f32 %v308_v63, %v129_v54  ;;  %2052 = vmatpush1.bf16.msra.mxu1 %v3871_v57  ;;  %v350_v6 = vadd.f32 %v349_v2, %v137_v60  ;;  %v3916_v53 = vld [vmem:[#allocation5 + $0x5e0] ss:$16 sps:$4 sm:$0xff]   ;;  %v3924_v57 = vld [vmem:[#allocation5 + $0x5c4] ss:$16 sps:$4 sm:$0xff]  }
 0x10b   :  { %2012 = vmatprep.subr.bf16.mxu0 %v3876_v58  ;;  %v310_v5 = vpop.f32.mrf.mxu0  ;;  %2053 = vmatprep.subr.bf16.mxu1 %v3879_v61  ;;  %v351_v9 = vpop.f32.mrf.mxu1  ;;  %v3919_v54 = vld [vmem:[#allocation5 + $0x7e0] ss:$16 sps:$4 sm:$0xff]   ;;  %v3927_v58 = vld [vmem:[#allocation5 + $0x7c4] ss:$16 sps:$4 sm:$0xff]  }
 0x10c   :  { %v359_v8 = vmax.f32 %v309_v1, 0.0  ;;  %v361_v11 = vmax.f32 %v350_v6, 0.0  ;;  %3771 = vset.pattern.permute.xlu0 %v4383_v33  ;;  %v3922_v60 = vld [vmem:[#allocation5 + $0x5c0] ss:$16 sps:$4 sm:$0xff]   ;;  %v3930_v63 = vld [vmem:[#allocation5 + $0x5a4] ss:$16 sps:$4 sm:$0xff]  }
 0x10d   :  { %v311_v12 = vpop.f32.mrf.mxu0  ;;  %v352_v15 = vpop.f32.mrf.mxu1  ;;  %v3925_v61 = vld [vmem:[#allocation5 + $0x7c0] ss:$16 sps:$4 sm:$0xff]   ;;  %v3963_v33 = vld [vmem:[#allocation5 + $0x704] ss:$16 sps:$4 sm:$0xff]  }
 0x10e   :  { %2013 = vmatpush1.bf16.msra.mxu0 %v3874_v0  ;;  %v4522_v14 = vpack.c.bf16 %v359_v8, %v359_v8  ;;  %2054 = vmatpush1.bf16.msra.mxu1 %v3877_v3  ;;  %v4524_v18 = vpack.c.bf16 %v361_v11, %v361_v11  ;;  %v3933_v0 = vld [vmem:[#allocation5 + $0x7a4] ss:$16 sps:$4 sm:$0xff]   ;;  %v3928_v1 = vld [vmem:[#allocation5 + $0x5a0] ss:$16 sps:$4 sm:$0xff]   ;;  %v4532_v12 = vsub.s32 4, %v4466_v23 }
 0x10f   :  { %2014 = vmatprep.subr.bf16.mxu0 %v3882_v4  ;;  %2055 = vmatprep.subr.bf16.mxu1 %v3885_v7  ;;  %v3931_v2 = vld [vmem:[#allocation5 + $0x7a0] ss:$16 sps:$4 sm:$0xff]   ;;  %v3936_v3 = vld [vmem:[#allocation5 + $0x584] ss:$16 sps:$4 sm:$0xff]  }
 0x110   :  { %2042 = vmatprep.mubr.bf16.mxu0 %v4522_v14  ;;  %2083 = vmatprep.mubr.bf16.mxu1 %v4524_v18  ;;  %v3939_v4 = vld [vmem:[#allocation5 + $0x784] ss:$16 sps:$4 sm:$0xff]   ;;  %v3934_v5 = vld [vmem:[#allocation5 + $0x580] ss:$16 sps:$4 sm:$0xff]  }
 0x111   :  { %v3937_v6 = vld [vmem:[#allocation5 + $0x780] ss:$16 sps:$4 sm:$0xff]   ;;  %v3942_v7 = vld [vmem:[#allocation5 + $0x564] ss:$16 sps:$4 sm:$0xff]  }
 0x112   :  { %2015 = vmatpush1.bf16.msra.mxu0 %v3880_v13  ;;  %2056 = vmatpush1.bf16.msra.mxu1 %v3883_v16  ;;  %v3945_v8 = vld [vmem:[#allocation5 + $0x764] ss:$16 sps:$4 sm:$0xff]   ;;  %v3940_v9 = vld [vmem:[#allocation5 + $0x560] ss:$16 sps:$4 sm:$0xff]   ;;  %v133_v16 = vrot.slane %v4474_v25, %v4529_v10 }
 0x113   :  { %2016 = vmatprep.subr.bf16.mxu0 %v3888_v17  ;;  %2057 = vmatprep.subr.bf16.mxu1 %v3891_v19  ;;  %v3943_v11 = vld [vmem:[#allocation5 + $0x760] ss:$16 sps:$4 sm:$0xff]   ;;  %v3948_v13 = vld [vmem:[#allocation5 + $0x544] ss:$16 sps:$4 sm:$0xff]   ;;  %v125_v19 = vrot.slane %v4474_v25, %v4532_v12 }
 0x114   :  { %v3951_v15 = vld [vmem:[#allocation5 + $0x744] ss:$16 sps:$4 sm:$0xff]   ;;  %v3946_v17 = vld [vmem:[#allocation5 + $0x540] ss:$16 sps:$4 sm:$0xff]   ;;  %v348_v23 = vadd.f32 %v4514_v62, %v133_v16  ;;  %v3969_v62 = vld [vmem:[#allocation5 + $0x2ec] ss:$16 sps:$4 sm:$0xff]  }
 0x115   :  { %v3958_v25 = vld [vmem:[#allocation5 + $0x500] ss:$16 sps:$4 sm:$0xff]   ;;  %v4012_v16 = vld [vmem:[#allocation5 + $0x1e8] ss:$16 sps:$4 sm:$0xff]  }
 0x116   :  { %2017 = vmatpush1.bf16.msra.mxu0 %v3886_v21  ;;  %2058 = vmatpush1.bf16.msra.mxu1 %v3889_v22  ;;  %v3954_v21 = vld [vmem:[#allocation5 + $0x524] ss:$16 sps:$4 sm:$0xff]  }
 0x117   :  { %2018 = vmatprep.subr.bf16.mxu0 %v3894_v29  ;;  %2059 = vmatprep.subr.bf16.mxu1 %v3897_v30  ;;  %v3957_v22 = vld [vmem:[#allocation5 + $0x724] ss:$16 sps:$4 sm:$0xff]   ;;  %v3952_v29 = vld [vmem:[#allocation5 + $0x520] ss:$16 sps:$4 sm:$0xff]   ;;  %v307_v30 = vadd.f32 %v4509_v59, %v125_v19  ;;  %v3964_v59 = vld [vmem:[#allocation5 + $0xe8] ss:$16 sps:$4 sm:$0xff]  }
 0x118   :  { %v4020_v19 = vld [vmem:[#allocation5 + $0x1cc] ss:$16 sps:$4 sm:$0xff]  }
 0x11a   :  { %2019 = vmatpush1.bf16.msra.mxu0 %v3892_v32  ;;  %2060 = vmatpush1.bf16.msra.mxu1 %v3895_v34  ;;  %v3960_v32 = vld [vmem:[#allocation5 + $0x504] ss:$16 sps:$4 sm:$0xff]   ;;  %v360_v34 = vmax.f32 %v348_v23, 0.0  ;;  %v4026_v23 = vld [vmem:[#allocation5 + $0x1ac] ss:$16 sps:$4 sm:$0xff]  }
 0x11b   :  { %2020 = vmatprep.subr.bf16.mxu0 %v3900_v35  ;;  %2061 = vmatprep.subr.bf16.mxu1 %v3903_v36  ;;  %v358_v35 = vmax.f32 %v307_v30, 0.0  ;;  %v3961_v36 = vld [vmem:[#allocation5 + $0x700] ss:$16 sps:$4 sm:$0xff]   ;;  %v4024_v30 = vld [vmem:[#allocation5 + $0x1a8] ss:$16 sps:$4 sm:$0xff]  }
 0x11e   :  { %2021 = vmatpush1.bf16.msra.mxu0 %v3898_v37  ;;  %2062 = vmatpush1.bf16.msra.mxu1 %v3901_v38  ;;  %v3966_v37 = vld [vmem:[#allocation5 + $0xec] ss:$16 sps:$4 sm:$0xff]   ;;  %v4540_v38 = vpack.c.bf16 %v360_v34, %v360_v34  ;;  %v4030_v34 = vld [vmem:[#allocation5 + $0x188] ss:$16 sps:$4 sm:$0xff]  }
 0x11f   :  { %2022 = vmatprep.subr.bf16.mxu0 %v3906_v39  ;;  %2063 = vmatprep.subr.bf16.mxu1 %v3909_v41  ;;  %v4542_v39 = vpack.c.bf16 %v358_v35, %v358_v35  ;;  %v3967_v41 = vld [vmem:[#allocation5 + $0x2e8] ss:$16 sps:$4 sm:$0xff]   ;;  %v4038_v35 = vld [vmem:[#allocation5 + $0x16c] ss:$16 sps:$4 sm:$0xff]  }
 0x122   :  { %2023 = vmatpush1.bf16.msra.mxu0 %v3904_v42  ;;  %2064 = vmatpush1.bf16.msra.mxu1 %v3907_v43  ;;  %v3972_v42 = vld [vmem:[#allocation5 + $0xcc] ss:$16 sps:$4 sm:$0xff]  }
 0x123   :  { %2024 = vmatprep.subr.bf16.mxu0 %v3912_v44  ;;  %2065 = vmatprep.subr.bf16.mxu1 %v3915_v46  ;;  %v3975_v43 = vld [vmem:[#allocation5 + $0x2cc] ss:$16 sps:$4 sm:$0xff]   ;;  %v3970_v44 = vld [vmem:[#allocation5 + $0xc8] ss:$16 sps:$4 sm:$0xff]  }
 0x124   :  { %v3973_v46 = vld [vmem:[#allocation5 + $0x2c8] ss:$16 sps:$4 sm:$0xff]  }
 0x126   :  { %2025 = vmatpush1.bf16.msra.mxu0 %v3910_v47  ;;  %2066 = vmatpush1.bf16.msra.mxu1 %v3913_v48  ;;  %v3978_v47 = vld [vmem:[#allocation5 + $0xac] ss:$16 sps:$4 sm:$0xff]  }
 0x127   :  { %2026 = vmatprep.subr.bf16.mxu0 %v3918_v49  ;;  %2067 = vmatprep.subr.bf16.mxu1 %v3921_v52  ;;  %v3981_v48 = vld [vmem:[#allocation5 + $0x2ac] ss:$16 sps:$4 sm:$0xff]   ;;  %v3976_v49 = vld [vmem:[#allocation5 + $0xa8] ss:$16 sps:$4 sm:$0xff]  }
 0x128   :  { %v3979_v52 = vld [vmem:[#allocation5 + $0x2a8] ss:$16 sps:$4 sm:$0xff]  }
 0x12a   :  { %2027 = vmatpush2.bf16.msra.mxu0 %v3916_v53  ;;  %2068 = vmatpush2.bf16.msra.mxu1 %v3919_v54  ;;  %v3984_v53 = vld [vmem:[#allocation5 + $0x8c] ss:$16 sps:$4 sm:$0xff]  }
 0x12b   :  { %2028 = vmatprep.subr.bf16.mxu0 %v3924_v57  ;;  %2069 = vmatprep.subr.bf16.mxu1 %v3927_v58  ;;  %v3987_v54 = vld [vmem:[#allocation5 + $0x28c] ss:$16 sps:$4 sm:$0xff]   ;;  %v3982_v57 = vld [vmem:[#allocation5 + $0x88] ss:$16 sps:$4 sm:$0xff]  }
 0x12c   :  { %v3990_v58 = vld [vmem:[#allocation5 + $0x6c] ss:$16 sps:$4 sm:$0xff]  }
 0x12e   :  { %2029 = vmatpush2.bf16.msra.mxu0 %v3922_v60  ;;  %2070 = vmatpush2.bf16.msra.mxu1 %v3925_v61  ;;  %v3993_v60 = vld [vmem:[#allocation5 + $0x26c] ss:$16 sps:$4 sm:$0xff]   ;;  %v3991_v61 = vld [vmem:[#allocation5 + $0x268] ss:$16 sps:$4 sm:$0xff]  }
 0x12f   :  { %2030 = vmatprep.subr.bf16.mxu0 %v3930_v63  ;;  %2071 = vmatprep.subr.bf16.mxu1 %v3933_v0  ;;  %v3996_v63 = vld [vmem:[#allocation5 + $0x4c] ss:$16 sps:$4 sm:$0xff]  }
 0x130   :  { %v3999_v0 = vld [vmem:[#allocation5 + $0x24c] ss:$16 sps:$4 sm:$0xff]  }
 0x132   :  { %2031 = vmatpush2.bf16.msra.mxu0 %v3928_v1  ;;  %2072 = vmatpush2.bf16.msra.mxu1 %v3931_v2  ;;  %v3994_v1 = vld [vmem:[#allocation5 + $0x48] ss:$16 sps:$4 sm:$0xff]  }
 0x133   :  { %2032 = vmatprep.subr.bf16.mxu0 %v3936_v3  ;;  %2073 = vmatprep.subr.bf16.mxu1 %v3939_v4  ;;  %v3997_v2 = vld [vmem:[#allocation5 + $0x248] ss:$16 sps:$4 sm:$0xff]   ;;  %v4002_v3 = vld [vmem:[#allocation5 + $0x2c] ss:$16 sps:$4 sm:$0xff]  }
 0x134   :  { %v4005_v4 = vld [vmem:[#allocation5 + $0x22c] ss:$16 sps:$4 sm:$0xff]  }
 0x136   :  { %2033 = vmatpush2.bf16.msra.mxu0 %v3934_v5  ;;  %2074 = vmatpush2.bf16.msra.mxu1 %v3937_v6  ;;  %v4000_v5 = vld [vmem:[#allocation5 + $0x28] ss:$16 sps:$4 sm:$0xff]  }
 0x137   :  { %2034 = vmatprep.subr.bf16.mxu0 %v3942_v7  ;;  %2075 = vmatprep.subr.bf16.mxu1 %v3945_v8  ;;  %v4003_v6 = vld [vmem:[#allocation5 + $0x228] ss:$16 sps:$4 sm:$0xff]   ;;  %v4008_v7 = vld [vmem:[#allocation5 + $0xc] ss:$16 sps:$4 sm:$0xff]  }
 0x138   :  { %v4011_v8 = vld [vmem:[#allocation5 + $0x20c] ss:$16 sps:$4 sm:$0xff]  }
 0x13a   :  { %2035 = vmatpush2.bf16.msra.mxu0 %v3940_v9  ;;  %2076 = vmatpush2.bf16.msra.mxu1 %v3943_v11  ;;  %v4006_v9 = vld [vmem:[#allocation5 + $0x8] ss:$16 sps:$4 sm:$0xff]  }
 0x13b   :  { %2036 = vmatprep.subr.bf16.mxu0 %v3948_v13  ;;  %2077 = vmatprep.subr.bf16.mxu1 %v3951_v15  ;;  %v4009_v11 = vld [vmem:[#allocation5 + $0x208] ss:$16 sps:$4 sm:$0xff]   ;;  %v4014_v13 = vld [vmem:[#allocation5 + $0x1ec] ss:$16 sps:$4 sm:$0xff]  }
 0x13c   :  { %v4017_v15 = vld [vmem:[#allocation5 + $0x3ec] ss:$16 sps:$4 sm:$0xff]  }
 0x13e   :  { %2037 = vmatpush2.bf16.msra.mxu0 %v3946_v17  ;;  %2078 = vmatpush2.bf16.msra.mxu1 %v3949_v20  ;;  %v4015_v17 = vld [vmem:[#allocation5 + $0x3e8] ss:$16 sps:$4 sm:$0xff]   ;;  %v4023_v20 = vld [vmem:[#allocation5 + $0x3cc] ss:$16 sps:$4 sm:$0xff]  }
 0x13f   :  { %2038 = vmatprep.subr.bf16.mxu0 %v3954_v21  ;;  %2079 = vmatprep.subr.bf16.mxu1 %v3957_v22  ;;  %v4018_v21 = vld [vmem:[#allocation5 + $0x1c8] ss:$16 sps:$4 sm:$0xff]  }
 0x140   :  { %v4021_v22 = vld [vmem:[#allocation5 + $0x3c8] ss:$16 sps:$4 sm:$0xff]  }
 0x142   :  { %2039 = vmatpush2.bf16.msra.mxu0 %v3952_v29  ;;  %2080 = vmatpush2.bf16.msra.mxu1 %v3955_v31  ;;  %v4029_v29 = vld [vmem:[#allocation5 + $0x3ac] ss:$16 sps:$4 sm:$0xff]   ;;  %v4027_v31 = vld [vmem:[#allocation5 + $0x3a8] ss:$16 sps:$4 sm:$0xff]  }
 0x143   :  { %2040 = vmatprep.subr.bf16.mxu0 %v3960_v32  ;;  %2081 = vmatprep.subr.bf16.mxu1 %v3963_v33  ;;  %v4032_v32 = vld [vmem:[#allocation5 + $0x18c] ss:$16 sps:$4 sm:$0xff]  }
 0x144   :  { %v4035_v33 = vld [vmem:[#allocation5 + $0x38c] ss:$16 sps:$4 sm:$0xff]  }
 0x146   :  { %2041 = vmatpush2.bf16.msra.mxu0 %v3958_v25  ;;  %2082 = vmatpush2.bf16.msra.mxu1 %v3961_v36  ;;  %v4033_v25 = vld [vmem:[#allocation5 + $0x388] ss:$16 sps:$4 sm:$0xff]   ;;  %v4041_v36 = vld [vmem:[#allocation5 + $0x36c] ss:$16 sps:$4 sm:$0xff]  }
 0x147   :  { %2092 = vmatprep.subr.bf16.mxu0 %v3966_v37  ;;  %2133 = vmatprep.subr.bf16.mxu1 %v3969_v62  ;;  %v4036_v37 = vld [vmem:[#allocation5 + $0x168] ss:$16 sps:$4 sm:$0xff]  }
 0x148   :  { %v4039_v62 = vld [vmem:[#allocation5 + $0x368] ss:$16 sps:$4 sm:$0xff]  }
 0x149   :  { %2043 = vmatmul.mubr.bf16.vlgmr.msra.gmra.mxu0 %v4542_v39  ;;  %2084 = vmatmul.mubr.bf16.vlgmr.msra.gmra.mxu1 %v4540_v38 }
 0x14a   :  { %2093 = vmatpush1.bf16.msra.mxu0 %v3964_v59  ;;  %2124 = vmatprep.mubr.bf16.mxu0 %v4501_v51  ;;  %v3985_v51 = vld [vmem:[#allocation5 + $0x288] ss:$16 sps:$4 sm:$0xff]   ;;  %v4044_v59 = vld [vmem:[#allocation5 + $0x14c] ss:$16 sps:$4 sm:$0xff]  }
 0x14b   :  { %2134 = vmatpush1.bf16.msra.mxu1 %v3967_v41  ;;  %2165 = vmatprep.mubr.bf16.mxu1 %v4507_v56  ;;  %v3988_v56 = vld [vmem:[#allocation5 + $0x68] ss:$16 sps:$4 sm:$0xff]   ;;  %v4047_v41 = vld [vmem:[#allocation5 + $0x34c] ss:$16 sps:$4 sm:$0xff]  }
 0x14c   :  { %2094 = vmatprep.subr.bf16.mxu0 %v3972_v42  ;;  %2135 = vmatprep.subr.bf16.mxu1 %v3975_v43  ;;  %v4042_v42 = vld [vmem:[#allocation5 + $0x148] ss:$16 sps:$4 sm:$0xff]  }
 0x14d   :  { %v4045_v43 = vld [vmem:[#allocation5 + $0x348] ss:$16 sps:$4 sm:$0xff]  }
 0x14e   :  { %2095 = vmatpush1.bf16.msra.mxu0 %v3970_v44  ;;  %v4050_v44 = vld [vmem:[#allocation5 + $0x12c] ss:$16 sps:$4 sm:$0xff]  }
 0x14f   :  { %2136 = vmatpush1.bf16.msra.mxu1 %v3973_v46  ;;  %2096 = vmatprep.subr.bf16.mxu0 %v3978_v47  ;;  %v4053_v46 = vld [vmem:[#allocation5 + $0x32c] ss:$16 sps:$4 sm:$0xff]   ;;  %v4048_v47 = vld [vmem:[#allocation5 + $0x128] ss:$16 sps:$4 sm:$0xff]  }
 0x150   :  { %2137 = vmatprep.subr.bf16.mxu1 %v3981_v48  ;;  %v4051_v48 = vld [vmem:[#allocation5 + $0x328] ss:$16 sps:$4 sm:$0xff]  }
 0x152   :  { %2097 = vmatpush1.bf16.msra.mxu0 %v3976_v49  ;;  %v4056_v49 = vld [vmem:[#allocation5 + $0x10c] ss:$16 sps:$4 sm:$0xff]  }
 0x153   :  { %2138 = vmatpush1.bf16.msra.mxu1 %v3979_v52  ;;  %2098 = vmatprep.subr.bf16.mxu0 %v3984_v53  ;;  %v4059_v52 = vld [vmem:[#allocation5 + $0x30c] ss:$16 sps:$4 sm:$0xff]   ;;  %v4054_v53 = vld [vmem:[#allocation5 + $0x108] ss:$16 sps:$4 sm:$0xff]  }
 0x154   :  { %2139 = vmatprep.subr.bf16.mxu1 %v3987_v54  ;;  %v4057_v54 = vld [vmem:[#allocation5 + $0x308] ss:$16 sps:$4 sm:$0xff]  }
 0x156   :  { %2099 = vmatpush1.bf16.msra.mxu0 %v3982_v57  ;;  %v4062_v57 = vld [vmem:[#allocation5 + $0x4ec] ss:$16 sps:$4 sm:$0xff]  }
 0x157   :  { %2140 = vmatpush1.bf16.msra.mxu1 %v3985_v51  ;;  %2100 = vmatprep.subr.bf16.mxu0 %v3990_v58  ;;  %v4065_v51 = vld [vmem:[#allocation5 + $0x6ec] ss:$16 sps:$4 sm:$0xff]   ;;  %v4060_v58 = vld [vmem:[#allocation5 + $0x4e8] ss:$16 sps:$4 sm:$0xff]  }
 0x158   :  { %2141 = vmatprep.subr.bf16.mxu1 %v3993_v60  ;;  %v4063_v60 = vld [vmem:[#allocation5 + $0x6e8] ss:$16 sps:$4 sm:$0xff]  }
 0x15a   :  { %2101 = vmatpush1.bf16.msra.mxu0 %v3988_v56  ;;  %v4068_v56 = vld [vmem:[#allocation5 + $0x4cc] ss:$16 sps:$4 sm:$0xff]  }
 0x15b   :  { %2142 = vmatpush1.bf16.msra.mxu1 %v3991_v61  ;;  %2102 = vmatprep.subr.bf16.mxu0 %v3996_v63  ;;  %v4071_v61 = vld [vmem:[#allocation5 + $0x6cc] ss:$16 sps:$4 sm:$0xff]   ;;  %v4066_v63 = vld [vmem:[#allocation5 + $0x4c8] ss:$16 sps:$4 sm:$0xff]  }
 0x15c   :  { %2143 = vmatprep.subr.bf16.mxu1 %v3999_v0  ;;  %v4069_v0 = vld [vmem:[#allocation5 + $0x6c8] ss:$16 sps:$4 sm:$0xff]  }
 0x15e   :  { %2103 = vmatpush1.bf16.msra.mxu0 %v3994_v1  ;;  %v4074_v1 = vld [vmem:[#allocation5 + $0x4ac] ss:$16 sps:$4 sm:$0xff]  }
 0x15f   :  { %2144 = vmatpush1.bf16.msra.mxu1 %v3997_v2  ;;  %2104 = vmatprep.subr.bf16.mxu0 %v4002_v3  ;;  %v4077_v2 = vld [vmem:[#allocation5 + $0x6ac] ss:$16 sps:$4 sm:$0xff]   ;;  %v4072_v3 = vld [vmem:[#allocation5 + $0x4a8] ss:$16 sps:$4 sm:$0xff]  }
 0x160   :  { %2145 = vmatprep.subr.bf16.mxu1 %v4005_v4  ;;  %v4080_v4 = vld [vmem:[#allocation5 + $0x48c] ss:$16 sps:$4 sm:$0xff]  }
 0x162   :  { %2105 = vmatpush1.bf16.msra.mxu0 %v4000_v5  ;;  %v4552_v5 = vld [vmem:[#allocation7] sm:$0xaa] }
 0x163   :  { %2146 = vmatpush1.bf16.msra.mxu1 %v4003_v6  ;;  %2106 = vmatprep.subr.bf16.mxu0 %v4008_v7  ;;  %v4554_v6 = vpop.permute.xlu0 %2262  ;;  %v4559_v7 = vunpack.c.h.bf16 %v4552_v5 }
 0x164   :  { %2147 = vmatprep.subr.bf16.mxu1 %v4011_v8  ;;  %v4078_v8 = vld [vmem:[#allocation5 + $0x488] ss:$16 sps:$4 sm:$0xff]  }
 0x166   :  { %2107 = vmatpush1.bf16.msra.mxu0 %v4006_v9  ;;  %v2379_v9 = vrot.slane %v4559_v7, %v4477_v26 }
 0x167   :  { %2148 = vmatpush1.bf16.msra.mxu1 %v4009_v11  ;;  %2108 = vmatprep.subr.bf16.mxu0 %v4014_v13  ;;  %v2383_v11 = vrot.slane %v4559_v7, %v4529_v10  ;;  %v4081_v13 = vld [vmem:[#allocation5 + $0x688] ss:$16 sps:$4 sm:$0xff]  }
 0x168   :  { %2149 = vmatprep.subr.bf16.mxu1 %v4017_v15  ;;  %v4086_v15 = vld [vmem:[#allocation5 + $0x46c] ss:$16 sps:$4 sm:$0xff]  }
 0x16a   :  { %2109 = vmatpush2.bf16.msra.mxu0 %v4012_v16 }
 0x16b   :  { %2150 = vmatpush2.bf16.msra.mxu1 %v4015_v17  ;;  %2110 = vmatprep.subr.bf16.mxu0 %v4020_v19  ;;  %v4089_v19 = vld [vmem:[#allocation5 + $0x66c] ss:$16 sps:$4 sm:$0xff]  }
 0x16c   :  { %2151 = vmatprep.subr.bf16.mxu1 %v4023_v20  ;;  %v2399_v20 = vrot.slane %v2379_v9, %v4477_v26  ;;  %v4132_v9 = vld [vmem:[#allocation5 + $0x568] ss:$16 sps:$4 sm:$0xff]  }
 0x16e   :  { %2111 = vmatpush2.bf16.msra.mxu0 %v4018_v21  ;;  %v2403_v21 = vrot.slane %v2383_v11, %v4477_v26  ;;  %v4135_v11 = vld [vmem:[#allocation5 + $0x768] ss:$16 sps:$4 sm:$0xff]  }
 0x16f   :  { %2152 = vmatpush2.bf16.msra.mxu1 %v4021_v22  ;;  %2112 = vmatprep.subr.bf16.mxu0 %v4026_v23  ;;  %v4574_v22 = vpop.permute.xlu1 %2363 }
 0x170   :  { %2153 = vmatprep.subr.bf16.mxu1 %v4029_v29 }
 0x172   :  { %2113 = vmatpush2.bf16.msra.mxu0 %v4024_v30  ;;  %v4084_v30 = vld [vmem:[#allocation5 + $0x468] ss:$16 sps:$4 sm:$0xff]  }
 0x173   :  { %2154 = vmatpush2.bf16.msra.mxu1 %v4027_v31  ;;  %2114 = vmatprep.subr.bf16.mxu0 %v4032_v32  ;;  %v4579_v31 = vmul.f32 %v2399_v20, %v4574_v22  ;;  %v4582_v32 = vmul.f32 %v2403_v21, %v4574_v22  ;;  %v4149_v20 = vld [vmem:[#allocation5 + $0x72c] ss:$16 sps:$4 sm:$0xff]   ;;  %v4144_v21 = vld [vmem:[#allocation5 + $0x528] ss:$16 sps:$4 sm:$0xff]  }
 0x174   :  { %2155 = vmatprep.subr.bf16.mxu1 %v4035_v33 }
 0x176   :  { %2115 = vmatpush2.bf16.msra.mxu0 %v4030_v34  ;;  %v4087_v34 = vld [vmem:[#allocation5 + $0x668] ss:$16 sps:$4 sm:$0xff]  }
 0x177   :  { %2156 = vmatpush2.bf16.msra.mxu1 %v4033_v25  ;;  %2116 = vmatprep.subr.bf16.mxu0 %v4038_v35  ;;  %v4092_v25 = vld [vmem:[#allocation5 + $0x44c] ss:$16 sps:$4 sm:$0xff]  }
 0x178   :  { %2157 = vmatprep.subr.bf16.mxu1 %v4041_v36 }
 0x17a   :  { %2117 = vmatpush2.bf16.msra.mxu0 %v4036_v37  ;;  %v4095_v37 = vld [vmem:[#allocation5 + $0x64c] ss:$16 sps:$4 sm:$0xff]  }
 0x17b   :  { %2158 = vmatpush2.bf16.msra.mxu1 %v4039_v62  ;;  %2118 = vmatprep.subr.bf16.mxu0 %v4044_v59  ;;  %v4090_v62 = vld [vmem:[#allocation5 + $0x448] ss:$16 sps:$4 sm:$0xff]  }
 0x17c   :  { %2159 = vmatprep.subr.bf16.mxu1 %v4047_v41  ;;  %v4093_v59 = vld [vmem:[#allocation5 + $0x648] ss:$16 sps:$4 sm:$0xff]   ;;  %v4098_v41 = vld [vmem:[#allocation5 + $0x42c] ss:$16 sps:$4 sm:$0xff]  }
 0x17e   :  { %2119 = vmatpush2.bf16.msra.mxu0 %v4042_v42  ;;  %v4101_v42 = vld [vmem:[#allocation5 + $0x62c] ss:$16 sps:$4 sm:$0xff]  }
 0x17f   :  { %2160 = vmatpush2.bf16.msra.mxu1 %v4045_v43  ;;  %2120 = vmatprep.subr.bf16.mxu0 %v4050_v44  ;;  %v4096_v43 = vld [vmem:[#allocation5 + $0x428] ss:$16 sps:$4 sm:$0xff]  }
 0x180   :  { %2161 = vmatprep.subr.bf16.mxu1 %v4053_v46  ;;  %v4584_v33 = vpop.permute.xlu0 %2312  ;;  %v4099_v44 = vld [vmem:[#allocation5 + $0x628] ss:$16 sps:$4 sm:$0xff]   ;;  %v4104_v46 = vld [vmem:[#allocation5 + $0x40c] ss:$16 sps:$4 sm:$0xff]  }
 0x182   :  { %2121 = vmatpush2.bf16.msra.mxu0 %v4048_v47  ;;  %v4107_v47 = vld [vmem:[#allocation5 + $0x60c] ss:$16 sps:$4 sm:$0xff]  }
 0x183   :  { %2162 = vmatpush2.bf16.msra.mxu1 %v4051_v48  ;;  %2122 = vmatprep.subr.bf16.mxu0 %v4056_v49  ;;  %v4102_v48 = vld [vmem:[#allocation5 + $0x408] ss:$16 sps:$4 sm:$0xff]  }
 0x184   :  { %2163 = vmatprep.subr.bf16.mxu1 %v4059_v52  ;;  %v4105_v49 = vld [vmem:[#allocation5 + $0x608] ss:$16 sps:$4 sm:$0xff]   ;;  %v4110_v52 = vld [vmem:[#allocation5 + $0x5ec] ss:$16 sps:$4 sm:$0xff]  }
 0x186   :  { %2123 = vmatpush2.bf16.msra.mxu0 %v4054_v53  ;;  %v4113_v53 = vld [vmem:[#allocation5 + $0x7ec] ss:$16 sps:$4 sm:$0xff]  }
 0x187   :  { %2164 = vmatpush2.bf16.msra.mxu1 %v4057_v54  ;;  %2174 = vmatprep.subr.bf16.mxu0 %v4062_v57  ;;  %v4108_v54 = vld [vmem:[#allocation5 + $0x5e8] ss:$16 sps:$4 sm:$0xff]  }
 0x188   :  { %2215 = vmatprep.subr.bf16.mxu1 %v4065_v51  ;;  %v4111_v57 = vld [vmem:[#allocation5 + $0x7e8] ss:$16 sps:$4 sm:$0xff]   ;;  %v4116_v51 = vld [vmem:[#allocation5 + $0x5cc] ss:$16 sps:$4 sm:$0xff]  }
 0x189   :  { %2125 = vmatmul.mubr.bf16.vlgmr.msra.gmra.mxu0 %v4505_v55  ;;  %v4075_v55 = vld [vmem:[#allocation5 + $0x6a8] ss:$16 sps:$4 sm:$0xff]  }
 0x18a   :  { %2166 = vmatmul.mubr.bf16.vlgmr.msra.gmra.mxu1 %v4499_v50  ;;  %2175 = vmatpush1.bf16.msra.mxu0 %v4060_v58  ;;  %v4083_v50 = vld [vmem:[#allocation5 + $0x68c] ss:$16 sps:$4 sm:$0xff]  }
 0x18b   :  { %2206 = vmatprep.mubr.bf16.mxu0 %v4522_v14  ;;  %2216 = vmatpush1.bf16.msra.mxu1 %v4063_v60  ;;  %v4556_v14 = vld [vmem:[#allocation7] sm:$0x55]  ;;  %v4119_v58 = vld [vmem:[#allocation5 + $0x7cc] ss:$16 sps:$4 sm:$0xff]   ;;  %v4114_v60 = vld [vmem:[#allocation5 + $0x5c8] ss:$16 sps:$4 sm:$0xff]  }
 0x18c   :  { %2247 = vmatprep.mubr.bf16.mxu1 %v4524_v18  ;;  %2176 = vmatprep.subr.bf16.mxu0 %v4068_v56  ;;  %v4562_v18 = vunpack.c.h.bf16 %v4556_v14  ;;  %v4117_v56 = vld [vmem:[#allocation5 + $0x7c8] ss:$16 sps:$4 sm:$0xff]  }
 0x18d   :  { %2217 = vmatprep.subr.bf16.mxu1 %v4071_v61  ;;  %v4122_v61 = vld [vmem:[#allocation5 + $0x5ac] ss:$16 sps:$4 sm:$0xff]  }
 0x18e   :  { %2177 = vmatpush1.bf16.msra.mxu0 %v4066_v63  ;;  %v2326_v16 = vrot.slane %v4562_v18, %v4480_v27  ;;  %v2330_v17 = vrot.slane %v4562_v18, %v4494_v40  ;;  %v4125_v63 = vld [vmem:[#allocation5 + $0x7ac] ss:$16 sps:$4 sm:$0xff]  }
 0x18f   :  { %2218 = vmatpush1.bf16.msra.mxu1 %v4069_v0  ;;  %2178 = vmatprep.subr.bf16.mxu0 %v4074_v1  ;;  %v4120_v0 = vld [vmem:[#allocation5 + $0x5a8] ss:$16 sps:$4 sm:$0xff]  }
 0x190   :  { %2219 = vmatprep.subr.bf16.mxu1 %v4077_v2  ;;  %v2346_v23 = vrot.slane %v2326_v16, %v4480_v27  ;;  %v2350_v29 = vrot.slane %v2330_v17, %v4480_v27  ;;  %v4123_v1 = vld [vmem:[#allocation5 + $0x7a8] ss:$16 sps:$4 sm:$0xff]   ;;  %v4128_v2 = vld [vmem:[#allocation5 + $0x58c] ss:$16 sps:$4 sm:$0xff]  }
 0x191   :  { %v4138_v16 = vld [vmem:[#allocation5 + $0x548] ss:$16 sps:$4 sm:$0xff]  }
 0x192   :  { %2179 = vmatpush1.bf16.msra.mxu0 %v4072_v3  ;;  %v4587_v35 = vmul.f32 %v2346_v23, %v4584_v33  ;;  %v4590_v36 = vmul.f32 %v2350_v29, %v4584_v33  ;;  %v4131_v3 = vld [vmem:[#allocation5 + $0x78c] ss:$16 sps:$4 sm:$0xff]   ;;  %v4141_v17 = vld [vmem:[#allocation5 + $0x748] ss:$16 sps:$4 sm:$0xff]  }
 0x193   :  { %2220 = vmatpush1.bf16.msra.mxu1 %v4075_v55  ;;  %2180 = vmatprep.subr.bf16.mxu0 %v4080_v4  ;;  %v4126_v55 = vld [vmem:[#allocation5 + $0x588] ss:$16 sps:$4 sm:$0xff]   ;;  %v4152_v29 = vld [vmem:[#allocation5 + $0x50c] ss:$16 sps:$4 sm:$0xff]  }
 0x194   :  { %2221 = vmatprep.subr.bf16.mxu1 %v4083_v50  ;;  %v4129_v4 = vld [vmem:[#allocation5 + $0x788] ss:$16 sps:$4 sm:$0xff]   ;;  %v4134_v50 = vld [vmem:[#allocation5 + $0x56c] ss:$16 sps:$4 sm:$0xff]  }
 0x195   :  { %v4147_v23 = vld [vmem:[#allocation5 + $0x728] ss:$16 sps:$4 sm:$0xff]  }
 0x196   :  { %2181 = vmatpush1.bf16.msra.mxu0 %v4078_v8  ;;  %v4137_v8 = vld [vmem:[#allocation5 + $0x76c] ss:$16 sps:$4 sm:$0xff]  }
 0x197   :  { %2222 = vmatpush1.bf16.msra.mxu1 %v4081_v13  ;;  %2182 = vmatprep.subr.bf16.mxu0 %v4086_v15  ;;  %v4140_v13 = vld [vmem:[#allocation5 + $0x54c] ss:$16 sps:$4 sm:$0xff]  }
 0x198   :  { %2223 = vmatprep.subr.bf16.mxu1 %v4089_v19  ;;  %v4143_v15 = vld [vmem:[#allocation5 + $0x74c] ss:$16 sps:$4 sm:$0xff]  }
 0x199   :  { %v4146_v19 = vld [vmem:[#allocation5 + $0x52c] ss:$16 sps:$4 sm:$0xff]  }
 0x19a   :  { %2183 = vmatpush1.bf16.msra.mxu0 %v4084_v30  ;;  %v4155_v30 = vld [vmem:[#allocation5 + $0x70c] ss:$16 sps:$4 sm:$0xff]  }
 0x19b   :  { %2224 = vmatpush1.bf16.msra.mxu1 %v4087_v34  ;;  %2184 = vmatprep.subr.bf16.mxu0 %v4092_v25  ;;  %v4150_v34 = vld [vmem:[#allocation5 + $0x508] ss:$16 sps:$4 sm:$0xff]  }
 0x19c   :  { %2225 = vmatprep.subr.bf16.mxu1 %v4095_v37  ;;  %v4153_v25 = vld [vmem:[#allocation5 + $0x708] ss:$16 sps:$4 sm:$0xff]   ;;  %v4158_v37 = vld [vmem:[#allocation8 + $0xac] ss:$12 sps:$4 sm:$0xff]  }
 0x19e   :  { %2185 = vmatpush1.bf16.msra.mxu0 %v4090_v62  ;;  %v4156_v62 = vld [vmem:[#allocation8 + $0xa8] ss:$12 sps:$4 sm:$0xff]  }
 0x19f   :  { %2226 = vmatpush1.bf16.msra.mxu1 %v4093_v59  ;;  %2186 = vmatprep.subr.bf16.mxu0 %v4098_v41  ;;  %v4161_v59 = vld [vmem:[#allocation8 + $0x94] ss:$12 sps:$4 sm:$0xff]  }
 0x1a0   :  { %2227 = vmatprep.subr.bf16.mxu1 %v4101_v42 }
 0x1a2   :  { %2187 = vmatpush1.bf16.msra.mxu0 %v4096_v43  ;;  %v4159_v43 = vld [vmem:[#allocation8 + $0x90] ss:$12 sps:$4 sm:$0xff]  }
 0x1a3   :  { %2228 = vmatpush1.bf16.msra.mxu1 %v4099_v44  ;;  %2188 = vmatprep.subr.bf16.mxu0 %v4104_v46  ;;  %v4164_v46 = vld [vmem:[#allocation8 + $0x7c] ss:$12 sps:$4 sm:$0xff]  }
 0x1a4   :  { %2229 = vmatprep.subr.bf16.mxu1 %v4107_v47 }
 0x1a6   :  { %2189 = vmatpush1.bf16.msra.mxu0 %v4102_v48 }
 0x1a7   :  { %2230 = vmatpush1.bf16.msra.mxu1 %v4105_v49  ;;  %2190 = vmatprep.subr.bf16.mxu0 %v4110_v52  ;;  %v4162_v52 = vld [vmem:[#allocation8 + $0x78] ss:$12 sps:$4 sm:$0xff]  }
 0x1a8   :  { %2231 = vmatprep.subr.bf16.mxu1 %v4113_v53 }
 0x1aa   :  { %2191 = vmatpush2.bf16.msra.mxu0 %v4108_v54 }
 0x1ab   :  { %2232 = vmatpush2.bf16.msra.mxu1 %v4111_v57  ;;  %2192 = vmatprep.subr.bf16.mxu0 %v4116_v51  ;;  %v4220_v57 = vld [vmem:[#allocation8 + $0x228] ss:$12 sps:$4 sm:$0xff]  }
 0x1ac   :  { %2233 = vmatprep.subr.bf16.mxu1 %v4119_v58  ;;  %v4225_v51 = vld [vmem:[#allocation8 + $0x214] ss:$12 sps:$4 sm:$0xff]  }
 0x1ad   :  { %v4165_v58 = vld [vmem:[#allocation8 + $0x60] ss:$12 sps:$4 sm:$0xff]  }
 0x1ae   :  { %2193 = vmatpush2.bf16.msra.mxu0 %v4114_v60  ;;  %v4170_v60 = vld [vmem:[#allocation8 + $0x4c] ss:$12 sps:$4 sm:$0xff]  }
 0x1af   :  { %2234 = vmatpush2.bf16.msra.mxu1 %v4117_v56  ;;  %2194 = vmatprep.subr.bf16.mxu0 %v4122_v61  ;;  %v4223_v56 = vld [vmem:[#allocation8 + $0x210] ss:$12 sps:$4 sm:$0xff]  }
 0x1b0   :  { %2235 = vmatprep.subr.bf16.mxu1 %v4125_v63  ;;  %v4228_v61 = vld [vmem:[#allocation8 + $0x1fc] ss:$12 sps:$4 sm:$0xff]  }
 0x1b1   :  { %v4168_v63 = vld [vmem:[#allocation8 + $0x48] ss:$12 sps:$4 sm:$0xff]  }
 0x1b2   :  { %2195 = vmatpush2.bf16.msra.mxu0 %v4120_v0  ;;  %v4173_v0 = vld [vmem:[#allocation8 + $0x34] ss:$12 sps:$4 sm:$0xff]  }
 0x1b3   :  { %2236 = vmatpush2.bf16.msra.mxu1 %v4123_v1  ;;  %2196 = vmatprep.subr.bf16.mxu0 %v4128_v2  ;;  %v4226_v1 = vld [vmem:[#allocation8 + $0x1f8] ss:$12 sps:$4 sm:$0xff]  }
 0x1b4   :  { %2237 = vmatprep.subr.bf16.mxu1 %v4131_v3  ;;  %v4231_v2 = vld [vmem:[#allocation8 + $0x1e4] ss:$12 sps:$4 sm:$0xff]  }
 0x1b5   :  { %v4171_v3 = vld [vmem:[#allocation8 + $0x30] ss:$12 sps:$4 sm:$0xff]  }
 0x1b6   :  { %2197 = vmatpush2.bf16.msra.mxu0 %v4126_v55  ;;  %v4176_v55 = vld [vmem:[#allocation8 + $0x1c] ss:$12 sps:$4 sm:$0xff]  }
 0x1b7   :  { %2238 = vmatpush2.bf16.msra.mxu1 %v4129_v4  ;;  %2198 = vmatprep.subr.bf16.mxu0 %v4134_v50  ;;  %v4229_v4 = vld [vmem:[#allocation8 + $0x1e0] ss:$12 sps:$4 sm:$0xff]  }
 0x1b8   :  { %2239 = vmatprep.subr.bf16.mxu1 %v4137_v8  ;;  %v4234_v50 = vld [vmem:[#allocation8 + $0x1cc] ss:$12 sps:$4 sm:$0xff]  }
 0x1b9   :  { %v4174_v8 = vld [vmem:[#allocation8 + $0x18] ss:$12 sps:$4 sm:$0xff]  }
 0x1ba   :  { %2199 = vmatpush2.bf16.msra.mxu0 %v4132_v9  ;;  %v4179_v9 = vld [vmem:[#allocation8 + $0x4] ss:$12 sps:$4 sm:$0xff]  }
 0x1bb   :  { %2240 = vmatpush2.bf16.msra.mxu1 %v4135_v11  ;;  %2200 = vmatprep.subr.bf16.mxu0 %v4140_v13  ;;  %v4232_v11 = vld [vmem:[#allocation8 + $0x1c8] ss:$12 sps:$4 sm:$0xff]  }
 0x1bc   :  { %2241 = vmatprep.subr.bf16.mxu1 %v4143_v15  ;;  %v4237_v13 = vld [vmem:[#allocation8 + $0x1b4] ss:$12 sps:$4 sm:$0xff]  }
 0x1bd   :  { %v4177_v15 = vld [vmem:[#allocation8] ss:$12 sps:$4 sm:$0xff]  }
 0x1be   :  { %2201 = vmatpush2.bf16.msra.mxu0 %v4138_v16  ;;  %v4182_v16 = vld [vmem:[#allocation8 + $0x16c] ss:$12 sps:$4 sm:$0xff]  }
 0x1bf   :  { %2242 = vmatpush2.bf16.msra.mxu1 %v4141_v17  ;;  %2202 = vmatprep.subr.bf16.mxu0 %v4146_v19  ;;  %v4235_v17 = vld [vmem:[#allocation8 + $0x1b0] ss:$12 sps:$4 sm:$0xff]  }
 0x1c0   :  { %2243 = vmatprep.subr.bf16.mxu1 %v4149_v20  ;;  %v4240_v19 = vld [vmem:[#allocation8 + $0x19c] ss:$12 sps:$4 sm:$0xff]  }
 0x1c1   :  { %v4180_v20 = vld [vmem:[#allocation8 + $0x168] ss:$12 sps:$4 sm:$0xff]  }
 0x1c2   :  { %2203 = vmatpush2.bf16.msra.mxu0 %v4144_v21  ;;  %v4185_v21 = vld [vmem:[#allocation8 + $0x154] ss:$12 sps:$4 sm:$0xff]  }
 0x1c3   :  { %2244 = vmatpush2.bf16.msra.mxu1 %v4147_v23  ;;  %2204 = vmatprep.subr.bf16.mxu0 %v4152_v29  ;;  %v4238_v23 = vld [vmem:[#allocation8 + $0x198] ss:$12 sps:$4 sm:$0xff]  }
 0x1c4   :  { %2245 = vmatprep.subr.bf16.mxu1 %v4155_v30  ;;  %v4243_v29 = vld [vmem:[#allocation8 + $0x184] ss:$12 sps:$4 sm:$0xff]  }
 0x1c5   :  { %v4183_v30 = vld [vmem:[#allocation8 + $0x150] ss:$12 sps:$4 sm:$0xff]  }
 0x1c6   :  { %2205 = vmatpush2.bf16.msra.mxu0 %v4150_v34  ;;  %v4188_v34 = vld [vmem:[#allocation8 + $0x13c] ss:$12 sps:$4 sm:$0xff]  }
 0x1c7   :  { %2246 = vmatpush2.bf16.msra.mxu1 %v4153_v25  ;;  %3125 = vmatprep.subr.bf16.mxu0 %v4158_v37  ;;  %v4241_v25 = vld [vmem:[#allocation8 + $0x180] ss:$12 sps:$4 sm:$0xff]  }
 0x1c8   :  { %v4246_v37 = vld [vmem:[#allocation8 + $0x2ec] ss:$12 sps:$4 sm:$0xff]  }
 0x1c9   :  { %2207 = vmatmul.mubr.bf16.vlgmr.msra.gmra.mxu0 %v4542_v39  ;;  %v4593_v41 = vpop.f32.mrf.mxu0  ;;  %v4596_v42 = vpop.f32.mrf.mxu1  ;;  %v4167_v39 = vld [vmem:[#allocation8 + $0x64] ss:$12 sps:$4 sm:$0xff]  }
 0x1ca   :  { %2248 = vmatmul.mubr.bf16.vlgmr.msra.gmra.mxu1 %v4540_v38  ;;  %3126 = vmatpush1.bf16.msra.mxu0 %v4156_v62  ;;  %v4222_v38 = vld [vmem:[#allocation8 + $0x22c] ss:$12 sps:$4 sm:$0xff]  }
 0x1cb   :  { %v4598_v44 = vpop.f32.mrf.mxu0  ;;  %3127 = vmatprep.subr.bf16.mxu0 %v4161_v59  ;;  %v4600_v47 = vpop.f32.mrf.mxu1  ;;  %3166 = vmatprep.subr.bf16.mxu1 %v4222_v38  ;;  %v4186_v62 = vld [vmem:[#allocation8 + $0x138] ss:$12 sps:$4 sm:$0xff]  }
 0x1cc   :  { %3167 = vmatpush1.bf16.msra.mxu1 %v4220_v57  ;;  %v4191_v59 = vld [vmem:[#allocation8 + $0x124] ss:$12 sps:$4 sm:$0xff]  }
 0x1cd   :  { %v1966_v48 = vpop.f32.mrf.mxu0  ;;  %v2007_v49 = vpop.f32.mrf.mxu1  ;;  %3168 = vmatprep.subr.bf16.mxu1 %v4225_v51  ;;  %v4250_v57 = vld [vmem:[#allocation8 + $0x2b8] ss:$12 sps:$4 sm:$0xff]   ;;  %v4195_v51 = vld [vmem:[#allocation8 + $0xf0] ss:$12 sps:$4 sm:$0xff]  }
 0x1ce   :  { %3128 = vmatpush1.bf16.msra.mxu0 %v4159_v43  ;;  %v4244_v43 = vld [vmem:[#allocation8 + $0x2e8] ss:$12 sps:$4 sm:$0xff]   ;;  %v4189_v48 = vld [vmem:[#allocation8 + $0x120] ss:$12 sps:$4 sm:$0xff]   ;;  %v4255_v38 = vld [vmem:[#allocation8 + $0x2a4] ss:$12 sps:$4 sm:$0xff]  }
 0x1cf   :  { %v1967_v53 = vpop.f32.mrf.mxu0  ;;  %3129 = vmatprep.subr.bf16.mxu0 %v4164_v46  ;;  %v2008_v54 = vpop.f32.mrf.mxu1  ;;  %v4249_v46 = vld [vmem:[#allocation8 + $0x2d4] ss:$12 sps:$4 sm:$0xff]   ;;  %v4194_v49 = vld [vmem:[#allocation8 + $0x10c] ss:$12 sps:$4 sm:$0xff]  }
 0x1d0   :  { %3169 = vmatpush1.bf16.msra.mxu1 %v4223_v56  ;;  %v4252_v53 = vld [vmem:[#allocation8 + $0x2bc] ss:$12 sps:$4 sm:$0xff]   ;;  %v4197_v54 = vld [vmem:[#allocation8 + $0xf4] ss:$12 sps:$4 sm:$0xff]  }
 0x1d1   :  { %3170 = vmatprep.subr.bf16.mxu1 %v4228_v61  ;;  %v4605_v56 = vld [vmem:[%s4691_s6] sm:$0xf]  ;;  %v2258_v61 = vunpack.c.l.bf16 %v4556_v14 }
 0x1d2   :  { %3130 = vmatpush1.bf16.msra.mxu0 %v4162_v52  ;;  %v4247_v52 = vld [vmem:[#allocation8 + $0x2d0] ss:$12 sps:$4 sm:$0xff]  }
 0x1d3   :  { %3131 = vmatprep.subr.bf16.mxu0 %v4167_v39  ;;  %v4192_v39 = vld [vmem:[#allocation8 + $0x108] ss:$12 sps:$4 sm:$0xff]   ;;  %v2318_v14 = vrot.slane %v2258_v61, %v4480_v27 }
 0x1d4   :  { %3171 = vmatpush1.bf16.msra.mxu1 %v4226_v1  ;;  %v631_v1 = vrot.slane %v4605_v56, %v4469_v24 }
 0x1d5   :  { %3172 = vmatprep.subr.bf16.mxu1 %v4231_v2  ;;  %v2270_v2 = vrot.slane %v2258_v61, %v4469_v24 }
 0x1d6   :  { %3132 = vmatpush1.bf16.msra.mxu0 %v4165_v58  ;;  %v4200_v58 = vld [vmem:[#allocation8 + $0xdc] ss:$12 sps:$4 sm:$0xff]  }
 0x1d7   :  { %3133 = vmatprep.subr.bf16.mxu0 %v4170_v60  ;;  %v4253_v60 = vld [vmem:[#allocation8 + $0x2a0] ss:$12 sps:$4 sm:$0xff]  }
 0x1d8   :  { %3173 = vmatpush1.bf16.msra.mxu1 %v4229_v4  ;;  %v4201_v4 = vld [vmem:[#allocation8 + $0xc0] ss:$12 sps:$4 sm:$0xff]  }
 0x1d9   :  { %3174 = vmatprep.subr.bf16.mxu1 %v4234_v50  ;;  %v2274_v50 = vrot.slane %v2258_v61, %v4532_v12 }
 0x1da   :  { %3134 = vmatpush1.bf16.msra.mxu0 %v4168_v63  ;;  %v4198_v63 = vld [vmem:[#allocation8 + $0xd8] ss:$12 sps:$4 sm:$0xff]  }
 0x1db   :  { %3135 = vmatprep.subr.bf16.mxu0 %v4173_v0  ;;  %v4203_v0 = vld [vmem:[#allocation8 + $0xc4] ss:$12 sps:$4 sm:$0xff]  }
 0x1dc   :  { %3175 = vmatpush1.bf16.msra.mxu1 %v4232_v11  ;;  %v2290_v11 = vrot.slane %v2270_v2, %v4469_v24 }
 0x1dd   :  { %3176 = vmatprep.subr.bf16.mxu1 %v4237_v13 }
 0x1de   :  { %3136 = vmatpush1.bf16.msra.mxu0 %v4171_v3  ;;  %v2360_v3 = vunpack.c.l.bf16 %v4552_v5  ;;  %v2322_v5 = vrot.slane %v2258_v61, %v4494_v40 }
 0x1df   :  { %3137 = vmatprep.subr.bf16.mxu0 %v4176_v55  ;;  %v635_v55 = vrot.slane %v4605_v56, %v4480_v27 }
 0x1e0   :  { %3177 = vmatpush1.bf16.msra.mxu1 %v4235_v17  ;;  %v2371_v13 = vrot.slane %v2360_v3, %v4477_v26  ;;  %v2338_v17 = vrot.slane %v2318_v14, %v4480_v27 }
 0x1e1   :  { %3178 = vmatprep.subr.bf16.mxu1 %v4240_v19 }
 0x1e2   :  { %3138 = vmatpush1.bf16.msra.mxu0 %v4174_v8  ;;  %v4204_v8 = vld [vmem:[#allocation8 + $0x170] ss:$12 sps:$4 sm:$0xff]  }
 0x1e3   :  { %3139 = vmatprep.subr.bf16.mxu0 %v4179_v9  ;;  %v1963_v9 = vadd.f32 %v4593_v41, %v631_v1  ;;  %v2419_v41 = vrot.slane %v2360_v3, %v4483_v28 }
 0x1e4   :  { %3179 = vmatpush1.bf16.msra.mxu1 %v4238_v23  ;;  %v2303_v23 = vmul.f32 %v2290_v11, %v4554_v6  ;;  %v4264_v11 = vld [vmem:[#allocation8 + $0x25c] ss:$12 sps:$4 sm:$0xff]  }
 0x1e5   :  { %3180 = vmatprep.subr.bf16.mxu1 %v4243_v29  ;;  %v2004_v19 = vadd.f32 %v4596_v42, %v1963_v9  ;;  %v2391_v29 = vrot.slane %v2371_v13, %v4477_v26  ;;  %v4262_v9 = vld [vmem:[#allocation8 + $0x258] ss:$12 sps:$4 sm:$0xff]  }
 0x1e6   :  { %3140 = vmatpush1.bf16.msra.mxu0 %v4177_v15  ;;  %v1965_v15 = vadd.f32 %v4598_v44, %v635_v55  ;;  %v4259_v55 = vld [vmem:[#allocation8 + $0x270] ss:$12 sps:$4 sm:$0xff]  }
 0x1e7   :  { %3141 = vmatprep.subr.bf16.mxu0 %v4182_v16  ;;  %v2294_v16 = vrot.slane %v2274_v50, %v4469_v24  ;;  %v4267_v13 = vld [vmem:[#allocation8 + $0x244] ss:$12 sps:$4 sm:$0xff]  }
 0x1e8   :  { %3181 = vmatpush1.bf16.msra.mxu1 %v4241_v25  ;;  %v2006_v44 = vadd.f32 %v4600_v47, %v1965_v15  ;;  %v2423_v25 = vrot.slane %v2360_v3, %v4497_v45  ;;  %v2404_v47 = vmul.f32 %v2391_v29, %v4574_v22  ;;  %v4208_v29 = vld [vmem:[#allocation8 + $0x140] ss:$12 sps:$4 sm:$0xff]  }
 0x1e9   :  { %3182 = vmatprep.subr.bf16.mxu1 %v4246_v37  ;;  %v2304_v42 = vmul.f32 %v2294_v16, %v4554_v6 }
 0x1ea   :  { %3142 = vmatpush2.bf16.msra.mxu0 %v4180_v20  ;;  %v2375_v20 = vrot.slane %v2360_v3, %v4529_v10  ;;  %v2351_v10 = vmul.f32 %v2338_v17, %v4584_v33  ;;  %v4261_v3 = vld [vmem:[#allocation8 + $0x274] ss:$12 sps:$4 sm:$0xff]  }
 0x1eb   :  { %3143 = vmatprep.subr.bf16.mxu0 %v4185_v21 }
 0x1ec   :  { %3183 = vmatpush2.bf16.msra.mxu1 %v4244_v43 }
 0x1ed   :  { %3184 = vmatprep.subr.bf16.mxu1 %v4249_v46  ;;  %v2395_v46 = vrot.slane %v2375_v20, %v4477_v26 }
 0x1ee   :  { %3144 = vmatpush2.bf16.msra.mxu0 %v4183_v30 }
 0x1ef   :  { %3145 = vmatprep.subr.bf16.mxu0 %v4188_v34  ;;  %v2342_v34 = vrot.slane %v2322_v5, %v4480_v27  ;;  %v4265_v5 = vld [vmem:[#allocation8 + $0x240] ss:$12 sps:$4 sm:$0xff]  }
 0x1f0   :  { %3185 = vmatpush2.bf16.msra.mxu1 %v4247_v52 }
 0x1f1   :  { %3186 = vmatprep.subr.bf16.mxu1 %v4252_v53  ;;  %v4636_v53 = vpop.permute.xlu1 %2413 }
 0x1f2   :  { %3146 = vmatpush2.bf16.msra.mxu0 %v4186_v62 }
 0x1f3   :  { %3147 = vmatprep.subr.bf16.mxu0 %v4191_v59 }
 0x1f4   :  { %3187 = vmatpush2.bf16.msra.mxu1 %v4250_v57 }
 0x1f5   :  { %3188 = vmatprep.subr.bf16.mxu1 %v4255_v38  ;;  %v2352_v38 = vmul.f32 %v2342_v34, %v4584_v33  ;;  %v4212_v34 = vld [vmem:[#allocation8 + $0x110] ss:$12 sps:$4 sm:$0xff]  }
 0x1f6   :  { %3148 = vmatpush2.bf16.msra.mxu0 %v4189_v48  ;;  %v2439_v48 = vrot.slane %v2419_v41, %v4483_v28  ;;  %v4206_v41 = vld [vmem:[#allocation8 + $0x158] ss:$12 sps:$4 sm:$0xff]  }
 0x1f7   :  { %3149 = vmatprep.subr.bf16.mxu0 %v4194_v49  ;;  %v4258_v49 = vld [vmem:[#allocation8 + $0x28c] ss:$12 sps:$4 sm:$0xff]  }
 0x1f8   :  { %3189 = vmatpush2.bf16.msra.mxu1 %v4253_v60  ;;  %v2452_v2 = vmul.f32 %v2439_v48, %v4636_v53 }
 0x1f9   :  { %3190 = vmatprep.subr.bf16.mxu1 %v4258_v49 }
 0x1fa   :  { %3150 = vmatpush2.bf16.msra.mxu0 %v4192_v39  ;;  %v4256_v39 = vld [vmem:[#allocation8 + $0x288] ss:$12 sps:$4 sm:$0xff]  }
 0x1fb   :  { %3151 = vmatprep.subr.bf16.mxu0 %v4197_v54 }
 0x1fc   :  { %3191 = vmatpush2.bf16.msra.mxu1 %v4256_v39 }
 0x1fd   :  { %3192 = vmatprep.subr.bf16.mxu1 %v4261_v3 }
 0x1fe   :  { %3152 = vmatpush2.bf16.msra.mxu0 %v4195_v51 }
 0x1ff   :  { %3153 = vmatprep.subr.bf16.mxu0 %v4200_v58  ;;  %v2443_v58 = vrot.slane %v2423_v25, %v4483_v28  ;;  %v4213_v25 = vld [vmem:[#allocation8 + $0x50] ss:$12 sps:$4 sm:$0xff]  }
 0x200   :  { %3193 = vmatpush2.bf16.msra.mxu1 %v4259_v55 }
 0x201   :  { %v2453_v14 = vmul.f32 %v2443_v58, %v4636_v53  ;;  %3194 = vmatprep.subr.bf16.mxu1 %v4264_v11 }
 0x202   :  { %3154 = vmatpush2.bf16.msra.mxu0 %v4198_v63  ;;  %v2405_v63 = vmul.f32 %v2395_v46, %v4574_v22 }
 0x203   :  { %3155 = vmatprep.subr.bf16.mxu0 %v4203_v0 }
 0x204   :  { %3195 = vmatpush2.bf16.msra.mxu1 %v4262_v9 }
 0x205   :  { %3196 = vmatprep.subr.bf16.mxu1 %v4267_v13 }
 0x206   :  { %3156 = vmatpush2.bf16.msra.mxu0 %v4201_v4 }
 0x207   :  { %3709 = vmatprep.subr.bf16.mxu0 %v4204_v8 }
 0x208   :  { %3197 = vmatpush2.bf16.msra.mxu1 %v4265_v5 }
 0x209   :  { %v2044_v21 = vpop.f32.mrf.mxu0  ;;  %v2085_v30 = vpop.f32.mrf.mxu1 }
 0x20a   :  { %v2045_v40 = vadd.f32 %v2044_v21, %v2004_v19  ;;  %v4205_v19 = vld [vmem:[#allocation8 + $0xb0] ss:$12 sps:$4 sm:$0xff]  }
 0x20b   :  { %v2046_v37 = vpop.f32.mrf.mxu0  ;;  %v2087_v43 = vpop.f32.mrf.mxu1  ;;  %v4268_v21 = vld [vmem:[#allocation8 + $0x2f0] ss:$12 sps:$4 sm:$0xff]  }
 0x20c   :  { %v2086_v62 = vadd.f32 %v2085_v30, %v2045_v40  ;;  %v2047_v59 = vadd.f32 %v2046_v37, %v2006_v44  ;;  %3731 = vmatprep.subr.bf16.mxu1 %v4268_v21  ;;  %v4209_v44 = vld [vmem:[#allocation8 + $0x80] ss:$12 sps:$4 sm:$0xff]   ;;  %v4210_v40 = vld [vmem:[#allocation8 + $0x128] ss:$12 sps:$4 sm:$0xff]   ;;  %v4214_v37 = vld [vmem:[#allocation8 + $0xf8] ss:$12 sps:$4 sm:$0xff]  }
 0x20d   :  { %v2048_v52 = vpop.f32.mrf.mxu0  ;;  %v2089_v51 = vpop.f32.mrf.mxu1  ;;  %v4211_v30 = vld [vmem:[#allocation8 + $0x68] ss:$12 sps:$4 sm:$0xff]  }
 0x20e   :  { %v2307_v54 = vadd.f32 %v2303_v23, %v2086_v62  ;;  %v2088_v57 = vadd.f32 %v2087_v43, %v2047_v59  ;;  %v4207_v23 = vld [vmem:[#allocation8 + $0x98] ss:$12 sps:$4 sm:$0xff]   ;;  %v4217_v62 = vld [vmem:[#allocation8 + $0x20] ss:$12 sps:$4 sm:$0xff]   ;;  %v4218_v59 = vld [vmem:[#allocation8 + $0xc8] ss:$12 sps:$4 sm:$0xff]   ;;  %v643_v51 = vrot.slane %v4605_v56, %v4483_v28 }
 0x20f   :  { %v2049_v60 = vpop.f32.mrf.mxu0  ;;  %v2090_v1 = vpop.f32.mrf.mxu1  ;;  %v4219_v43 = vld [vmem:[#allocation8 + $0x8] ss:$12 sps:$4 sm:$0xff]  }
 0x210   :  { %v2308_v61 = vadd.f32 %v2304_v42, %v2088_v57  ;;  %v2355_v0 = vadd.f32 %v2351_v10, %v2307_v54  ;;  %v4215_v42 = vld [vmem:[#allocation8 + $0x38] ss:$12 sps:$4 sm:$0xff]   ;;  %v4216_v10 = vld [vmem:[#allocation8 + $0xe0] ss:$12 sps:$4 sm:$0xff]   ;;  %v2278_v60 = vrot.slane %v4562_v18, %v4469_v24 }
 0x212   :  { %v2356_v4 = vadd.f32 %v2352_v38, %v2308_v61  ;;  %v2408_v50 = vadd.f32 %v2404_v47, %v2355_v0  ;;  %v639_v38 = vrot.slane %v4605_v56, %v4477_v26  ;;  %v2427_v0 = vrot.slane %v4559_v7, %v4483_v28 }
 0x214   :  { %v2456_v33 = vadd.f32 %v2452_v2, %v2408_v50  ;;  %v2409_v8 = vadd.f32 %v2405_v63, %v2356_v4  ;;  %v2282_v63 = vrot.slane %v4562_v18, %v4532_v12  ;;  %v2298_v2 = vrot.slane %v2278_v60, %v4469_v24 }
 0x216   :  { %v2457_v15 = vadd.f32 %v2453_v14, %v2409_v8  ;;  %v2460_v22 = vmax.f32 %v2456_v33, 0.0  ;;  %v2302_v56 = vrot.slane %v2282_v63, %v4469_v24  ;;  %v2431_v14 = vrot.slane %v4559_v7, %v4497_v45 }
 0x217   :  { %v2447_v8 = vrot.slane %v2427_v0, %v4483_v28  ;;  %v2305_v18 = vmul.f32 %v2298_v2, %v4554_v6  ;;  %v2596_v0 = vld [vmem:[%s4693_s8] sm:$0x7] }
 0x218   :  { %v2461_v16 = vmax.f32 %v2457_v15, 0.0  ;;  %v2464_v20 = vpack.c.bf16 %v2460_v22, %v2460_v22  ;;  %v2601_v2 = vrot.slane %v2596_v0, %v4469_v24 }
 0x21a   :  { %v2465_v17 = vpack.c.bf16 %v2461_v16, %v2461_v16  ;;  %v2306_v16 = vmul.f32 %v2302_v56, %v4554_v6 }
 0x21c   :  { %3157 = vmatprep.mubr.bf16.mxu0 %v2465_v17 }
 0x21d   :  { %3158 = vmatmul.mubr.bf16.vlgmr.msra.gmra.mxu0 %v2464_v20 }
 0x21e   :  { %3710 = vmatpush3.bf16.msra.mxu0 %v4205_v19  ;;  %3239 = vmatprep.mubr.bf16.mxu0 %v2465_v17 }
 0x21f   :  { %3711 = vmatprep.subr.bf16.mxu0 %v4206_v41  ;;  %v2454_v41 = vmul.f32 %v2447_v8, %v4636_v53 }
 0x222   :  { %3712 = vmatpush3.bf16.msra.mxu0 %v4207_v23 }
 0x223   :  { %3713 = vmatprep.subr.bf16.mxu0 %v4208_v29 }
 0x226   :  { %3714 = vmatpush3.bf16.msra.mxu0 %v4209_v44 }
 0x227   :  { %3715 = vmatprep.subr.bf16.mxu0 %v4210_v40 }
 0x22a   :  { %3716 = vmatpush3.bf16.msra.mxu0 %v4211_v30 }
 0x22b   :  { %3717 = vmatprep.subr.bf16.mxu0 %v4212_v34 }
 0x22e   :  { %3718 = vmatpush3.bf16.msra.mxu0 %v4213_v25 }
 0x22f   :  { %3719 = vmatprep.subr.bf16.mxu0 %v4214_v37 }
 0x232   :  { %3720 = vmatpush3.bf16.msra.mxu0 %v4215_v42 }
 0x233   :  { %3721 = vmatprep.subr.bf16.mxu0 %v4216_v10  ;;  %v4270_v10 = vld [vmem:[#allocation8 + $0x2d8] ss:$12 sps:$4 sm:$0xff]  }
 0x236   :  { %3722 = vmatpush3.bf16.msra.mxu0 %v4217_v62  ;;  %v4276_v62 = vld [vmem:[#allocation8 + $0x290] ss:$12 sps:$4 sm:$0xff]  }
 0x237   :  { %3723 = vmatprep.subr.bf16.mxu0 %v4218_v59  ;;  %v4277_v59 = vld [vmem:[#allocation8 + $0x1d0] ss:$12 sps:$4 sm:$0xff]  }
 0x23a   :  { %3724 = vmatpush3.bf16.msra.mxu0 %v4219_v43  ;;  %v4278_v43 = vld [vmem:[#allocation8 + $0x278] ss:$12 sps:$4 sm:$0xff]  }
 0x23d   :  { %3240 = vmatmul.mubr.bf16.vlgmr.msra.gmra.mxu0 %v2464_v20  ;;  %v2451_v20 = vrot.slane %v2431_v14, %v4483_v28  ;;  %v4269_v28 = vld [vmem:[#allocation8 + $0x230] ss:$12 sps:$4 sm:$0xff]  }
 0x23f   :  { %v2455_v44 = vmul.f32 %v2451_v20, %v4636_v53  ;;  %v4274_v53 = vld [vmem:[#allocation8 + $0x2a8] ss:$12 sps:$4 sm:$0xff]   ;;  %v2609_v20 = vrot.slane %v2596_v0, %v4477_v26 }
 0x249   :  { %v2126_v46 = vpop.f32.mrf.mxu0 }
 0x24a   :  { %v2167_v48 = vpop.f32.mrf.mxu1  ;;  %v2127_v58 = vadd.f32 %v2126_v46, %v639_v38  ;;  %v4279_v46 = vld [vmem:[#allocation8 + $0x1b8] ss:$12 sps:$4 sm:$0xff]  }
 0x24b   :  { %v2128_v49 = vpop.f32.mrf.mxu0 }
 0x24c   :  { %v2169_v47 = vpop.f32.mrf.mxu1  ;;  %v2129_v61 = vadd.f32 %v2128_v49, %v643_v51  ;;  %v2168_v1 = vadd.f32 %v2167_v48, %v2127_v58  ;;  %v4280_v48 = vld [vmem:[#allocation8 + $0x260] ss:$12 sps:$4 sm:$0xff]  }
 0x24d   :  { %v2130_v52 = vpop.f32.mrf.mxu0  ;;  %v4281_v49 = vld [vmem:[#allocation8 + $0x1a0] ss:$12 sps:$4 sm:$0xff]  }
 0x24e   :  { %v2171_v39 = vpop.f32.mrf.mxu1  ;;  %v2170_v55 = vadd.f32 %v2169_v47, %v2129_v61  ;;  %v4282_v47 = vld [vmem:[#allocation8 + $0x248] ss:$12 sps:$4 sm:$0xff]  }
 0x24f   :  { %v2131_v54 = vpop.f32.mrf.mxu0  ;;  %v4283_v52 = vld [vmem:[#allocation8 + $0x188] ss:$12 sps:$4 sm:$0xff]  }
 0x250   :  { %v2172_v57 = vpop.f32.mrf.mxu1 }
 0x289   :  { %v2208_v3 = vpop.f32.mrf.mxu0 }
 0x28a   :  { %v2209_v4 = vadd.f32 %v2208_v3, %v2168_v1  ;;  %v2249_v50 = vpop.f32.mrf.mxu1  ;;  %v3290_v1 = vld [vmem:[%s4694_s9] sm:$0x7] }
 0x28b   :  { %v2210_v33 = vpop.f32.mrf.mxu0  ;;  %v3291_v3 = vunpack.c.l.bf16 %v3290_v1 }
 0x28c   :  { %v2250_v9 = vadd.f32 %v2249_v50, %v2209_v4  ;;  %v2211_v11 = vadd.f32 %v2210_v33, %v2170_v55  ;;  %v2251_v13 = vpop.f32.mrf.mxu1  ;;  %v2605_v55 = vrot.slane %v2596_v0, %v4480_v27 }
 0x28d   :  { %v2212_v15 = vpop.f32.mrf.mxu0  ;;  %v3296_v50 = vrot.slane %v3291_v3, %v4469_v24  ;;  %v3300_v56 = vrot.slane %v3291_v3, %v4477_v26 }
 0x28e   :  { %v2309_v22 = vadd.f32 %v2305_v18, %v2250_v9  ;;  %v2252_v5 = vadd.f32 %v2251_v13, %v2211_v11  ;;  %v2253_v17 = vpop.f32.mrf.mxu1 }
 0x28f   :  { %v2213_v19 = vpop.f32.mrf.mxu0  ;;  %v3311_v11 = vrot.slane %v3296_v50, %v4469_v24  ;;  %v3315_v15 = vrot.slane %v3300_v56, %v4469_v24 }
 0x290   :  { %v2357_v45 = vadd.f32 %v4587_v35, %v2309_v22  ;;  %v2310_v7 = vadd.f32 %v2306_v16, %v2252_v5  ;;  %v2254_v21 = vpop.f32.mrf.mxu1  ;;  %v4271_v35 = vld [vmem:[#allocation8 + $0x218] ss:$12 sps:$4 sm:$0xff]  }
 0x292   :  { %v2410_v23 = vadd.f32 %v4579_v31, %v2357_v45  ;;  %v2358_v29 = vadd.f32 %v4590_v36, %v2310_v7  ;;  %v4272_v31 = vld [vmem:[#allocation8 + $0x2c0] ss:$12 sps:$4 sm:$0xff]   ;;  %v3304_v45 = vrot.slane %v3291_v3, %v4532_v12 }
 0x293   :  { %v4273_v36 = vld [vmem:[#allocation8 + $0x200] ss:$12 sps:$4 sm:$0xff]  }
 0x294   :  { %v2411_v40 = vadd.f32 %v4582_v32, %v2358_v29  ;;  %v2458_v30 = vadd.f32 %v2454_v41, %v2410_v23  ;;  %v4275_v32 = vld [vmem:[#allocation8 + $0x1e8] ss:$12 sps:$4 sm:$0xff]  }
 0x296   :  { %v2459_v6 = vadd.f32 %v2455_v44, %v2411_v40  ;;  %v2462_v34 = vmax.f32 %v2458_v30, 0.0  ;;  %v3319_v40 = vrot.slane %v3304_v45, %v4469_v24 }
 0x298   :  { %v2463_v25 = vmax.f32 %v2459_v6, 0.0  ;;  %v2466_v42 = vpack.c.bf16 %v2462_v34, %v2462_v34 }
 0x29a   :  { %v2467_v37 = vpack.c.bf16 %v2463_v25, %v2463_v25 }
 0x29c   :  { %3198 = vmatprep.mubr.bf16.mxu1 %v2467_v37 }
 0x29d   :  { %3199 = vmatmul.mubr.bf16.vlgmr.msra.gmra.mxu1 %v2466_v42 }
 0x29e   :  { %3732 = vmatpush3.bf16.msra.mxu1 %v4269_v28  ;;  %3279 = vmatprep.mubr.bf16.mxu1 %v2467_v37  ;;  %v3708_v37 = vld [vmem:[#allocation2] ss:$0 sm:$0xff] }
 0x29f   :  { %3733 = vmatprep.subr.bf16.mxu1 %v4270_v10 }
 0x2a2   :  { %3734 = vmatpush3.bf16.msra.mxu1 %v4271_v35 }
 0x2a3   :  { %3735 = vmatprep.subr.bf16.mxu1 %v4272_v31 }
 0x2a6   :  { %3736 = vmatpush3.bf16.msra.mxu1 %v4273_v36 }
 0x2a7   :  { %3737 = vmatprep.subr.bf16.mxu1 %v4274_v53 }
 0x2aa   :  { %3738 = vmatpush3.bf16.msra.mxu1 %v4275_v32 }
 0x2ab   :  { %3739 = vmatprep.subr.bf16.mxu1 %v4276_v62 }
 0x2ae   :  { %3740 = vmatpush3.bf16.msra.mxu1 %v4277_v59 }
 0x2af   :  { %3741 = vmatprep.subr.bf16.mxu1 %v4278_v43 }
 0x2b2   :  { %3742 = vmatpush3.bf16.msra.mxu1 %v4279_v46 }
 0x2b3   :  { %3743 = vmatprep.subr.bf16.mxu1 %v4280_v48 }
 0x2b6   :  { %3744 = vmatpush3.bf16.msra.mxu1 %v4281_v49 }
 0x2b7   :  { %3745 = vmatprep.subr.bf16.mxu1 %v4282_v47 }
 0x2ba   :  { %3746 = vmatpush3.bf16.msra.mxu1 %v4283_v52 }
 0x2bd   :  { %3280 = vmatmul.mubr.bf16.vlgmr.msra.gmra.mxu1 %v2466_v42 }
 0x2dd   :  { %v3159_v39 = vpop.f32.mrf.mxu0 }
 0x2de   :  { %v3160_v4 = vadd.f32 %v3159_v39, %v2601_v2 }
 0x2df   :  { %v3161_v54 = vpop.f32.mrf.mxu0 }
 0x2e0   :  { %v3162_v33 = vadd.f32 %v3161_v54, %v2605_v55 }
 0x2e1   :  { %v3163_v57 = vpop.f32.mrf.mxu0 }
 0x2e3   :  { %v3164_v38 = vpop.f32.mrf.mxu0 }
 0x2fd   :  { %v3725_v51 = vpop.f32.mrf.mxu0 }
 0x2ff   :  { %v3726_v58 = vpop.f32.mrf.mxu0 }
 0x300   :  { %v3727_v60 = vadd.f32 %v3726_v58, %v3725_v51 }
 0x301   :  { %v3728_v61 = vpop.f32.mrf.mxu0 }
 0x302   :  { %v3242_v21 = vadd.f32 %v3727_v60, %v2609_v20 }
 0x303   :  { %v3729_v63 = vpop.f32.mrf.mxu0 }
 0x35d   :  { %v3200_v14 = vpop.f32.mrf.mxu1 }
 0x35e   :  { %v3201_v8 = vadd.f32 %v3200_v14, %v3160_v4 }
 0x35f   :  { %v3202_v9 = vpop.f32.mrf.mxu1 }
 0x360   :  { %v3287_v18 = vmax.f32 %v3201_v8, 0.0  ;;  %v3203_v13 = vadd.f32 %v3202_v9, %v3162_v33 }
 0x361   :  { %v3204_v22 = vpop.f32.mrf.mxu1 }
 0x362   :  { %v3288_v5 = vmax.f32 %v3203_v13, 0.0  ;;  %v3320_v17 = vmul.f32 %v3311_v11, %v3287_v18 }
 0x363   :  { %v3205_v16 = vpop.f32.mrf.mxu1 }
 0x364   :  { %v3321_v27 = vmul.f32 %v3315_v15, %v3288_v5 }
 0x366   :  { %v3323_v19 = vadd.f32 %v3321_v27, %v3320_v17 }
 0x37d   :  { %v3747_v41 = vpop.f32.mrf.mxu1 }
 0x37f   :  { %v3748_v7 = vpop.f32.mrf.mxu1 }
 0x380   :  { %v3749_v23 = vadd.f32 %v3748_v7, %v3747_v41 }
 0x381   :  { %v3750_v29 = vpop.f32.mrf.mxu1 }
 0x382   :  { %v3282_v44 = vadd.f32 %v3749_v23, %v3242_v21 }
 0x383   :  { %v3751_v30 = vpop.f32.mrf.mxu1 }
 0x384   :  { %v3289_v6 = vmax.f32 %v3282_v44, 0.0 }
 0x386   :  { %v3322_v34 = vmul.f32 %v3319_v40, %v3289_v6 }
 0x388   :  { %v3324_v25 = vadd.f32 %v3323_v19, %v3322_v34 }
 0x38a   :  { %3325 = vadd.xlane.f32.xlu1 %v3324_v25 }
 0x413   :  { %v3326_v28 = vpop.xlane.xlu1 %3325 }
 0x414   :  { %v3334_v42 = vadd.f32 %v3708_v37, %v3326_v28 }
 0x416   :  { %3336 = vst.msk [vmem:[%s4696_s11] sm:$0xff] %vm3335_vm1, %v3334_v42 }
 0x417   :  { %3341 = vsyncpa [#allocation4], 1 }
 0x418   :  { %3342 = vsyncpa [#allocation6], 1 }
 0x419   :  { %3343 = vsyncpa [#allocation9], 1 }

</bundles_post_ra>
